<compile_context>
chip_gen: v6e
topology: v6e:2x2x1
jax: 0.10.0
libtpu: 0.0.40
codegen_flags: <defaults>
</compile_context>

<pallas_src>
import functools

import jax
import jax.numpy as jnp
import numpy as np
from jax import lax
from jax.experimental import pallas as pl
from jax.experimental.pallas import tpu as pltpu

EPS = 1e-5
LANE = 128
# Explicit scoped-VMEM limit: above the 16/32 MiB defaults, below every
# generation's physical VMEM (64 MiB on v7x), so larger tiles are allowed
# everywhere without risking an over-limit request.
VMEM_LIMIT_BYTES = 48 * 1024 * 1024


def _round_up(x, m):
    return (x + m - 1) // m * m


def _cparams():
    return pltpu.CompilerParams(
        dimension_semantics=("parallel", "parallel"),   # per-tile partial stats
        vmem_limit_bytes=VMEM_LIMIT_BYTES)              # -> no accumulation races


# ----------------------------------------------------------------------------
# Kernel A: conv_1 + conv_3 fused matmul (shared patches) + partial BN stats.
# ----------------------------------------------------------------------------
def _conv13_kernel(p_ref, w_ref, z1_ref, z3_ref, ps_ref, psq_ref, *,
                   tile_h, wo, c_pad):
    # [tile_m, K] @ [K, 2C] on the MXU (256-lane output), f32 accumulation.
    z = jnp.dot(p_ref[...], w_ref[...], preferred_element_type=jnp.float32)
    # Per-tile partial BN statistics (no bias, no padded rows -> no masking).
    ps_ref[...] = jnp.sum(z, axis=0, keepdims=True)[None]
    psq_ref[...] = jnp.sum(z * z, axis=0, keepdims=True)[None]
    # Split the fused Cout back into conv_1 / conv_3 image-layout tiles.
    z1_ref[...] = z[:, :c_pad].reshape(1, tile_h, wo, c_pad)
    z3_ref[...] = z[:, c_pad:].reshape(1, tile_h, wo, c_pad)


def conv13_call(patches, w13, *, n, n_rb, tile_h, wo, c_pad):
    tile_m = tile_h * wo
    k1 = patches.shape[1]
    ho = n_rb * tile_h
    kernel = functools.partial(_conv13_kernel, tile_h=tile_h, wo=wo,
                               c_pad=c_pad)
    return pl.pallas_call(
        kernel,
        grid=(n, n_rb),
        in_specs=[
            pl.BlockSpec((tile_m, k1), lambda i, r: (i * n_rb + r, 0)),
            pl.BlockSpec((k1, 2 * c_pad), lambda i, r: (0, 0)),   # resident W
        ],
        out_specs=[
            pl.BlockSpec((1, tile_h, wo, c_pad), lambda i, r: (i, r, 0, 0)),
            pl.BlockSpec((1, tile_h, wo, c_pad), lambda i, r: (i, r, 0, 0)),
            pl.BlockSpec((1, 1, 2 * c_pad), lambda i, r: (i * n_rb + r, 0, 0)),
            pl.BlockSpec((1, 1, 2 * c_pad), lambda i, r: (i * n_rb + r, 0, 0)),
        ],
        out_shape=[
            jax.ShapeDtypeStruct((n, ho, wo, c_pad), jnp.float32),       # z1
            jax.ShapeDtypeStruct((n, ho, wo, c_pad), jnp.float32),       # z3
            jax.ShapeDtypeStruct((n * n_rb, 1, 2 * c_pad), jnp.float32),  # sum
            jax.ShapeDtypeStruct((n * n_rb, 1, 2 * c_pad), jnp.float32),  # sumsq
        ],
        compiler_params=_cparams(),
    )(patches, w13)


# ----------------------------------------------------------------------------
# Kernel B: conv_2 as an in-kernel 3x3 tap loop over a spatial halo block,
# with bn_1 affine + ReLU fused on the input and partial bn_2 stats output.
# ----------------------------------------------------------------------------
def _conv2_kernel(zblk_ref, w2_ref, sc1_ref, sh1_ref,
                  z2_ref, ps_ref, psq_ref, *,
                  tile_h, wo, c_pad, n_rb, ksize, pad):
    rb = pl.program_id(1)
    hh = tile_h + 2 * pad
    ww = wo + 2 * pad

    # Halo block of raw conv_1 output (f32); fused bn_1 affine + ReLU.
    z = zblk_ref[...].reshape(hh, ww, c_pad)
    y = jnp.maximum(z * sc1_ref[...] + sh1_ref[...], 0.0)

    # Zero the spatial padding ring (left/right always; top row only for the
    # first row-block, bottom row only for the last one) -- the halo rows of
    # interior blocks are real neighbour data and stay untouched.
    row = lax.broadcasted_iota(jnp.int32, (hh, ww, 1), 0)
    col = lax.broadcasted_iota(jnp.int32, (hh, ww, 1), 1)
    valid = (col >= pad) & (col < ww - pad)
    valid &= jnp.logical_or(rb > 0, row >= pad)
    valid &= jnp.logical_or(rb < n_rb - 1, row < hh - pad)
    y = jnp.where(valid, y, 0.0)

    # 3x3 tap loop: 9 shifted [tile_h*Wo, C] x [C, C] MXU matmuls, f32 acc.
    w2 = w2_ref[...]                                  # [k, k, C, C] bf16
    acc = jnp.zeros((tile_h * wo, c_pad), jnp.float32)
    for kh in range(ksize):
        for kw in range(ksize):
            lhs = y[kh:kh + tile_h, kw:kw + wo, :].reshape(tile_h * wo, c_pad)
            acc = acc + jnp.dot(lhs.astype(jnp.bfloat16), w2[kh, kw],
                                preferred_element_type=jnp.float32)

    ps_ref[...] = jnp.sum(acc, axis=0, keepdims=True)[None]
    psq_ref[...] = jnp.sum(acc * acc, axis=0, keepdims=True)[None]
    z2_ref[...] = acc.reshape(1, tile_h, wo, c_pad)


def conv2_call(zblk, w2, sc1, sh1, *, n, n_rb, tile_h, wo, c_pad, ksize, pad):
    ho = n_rb * tile_h
    kernel = functools.partial(_conv2_kernel, tile_h=tile_h, wo=wo,
                               c_pad=c_pad, n_rb=n_rb, ksize=ksize, pad=pad)
    return pl.pallas_call(
        kernel,
        grid=(n, n_rb),
        in_specs=[
            pl.BlockSpec((1, tile_h + 2 * pad, wo + 2 * pad, c_pad),
                         lambda i, r: (i * n_rb + r, 0, 0, 0)),
            pl.BlockSpec((ksize, ksize, c_pad, c_pad),
                         lambda i, r: (0, 0, 0, 0)),               # resident W2
            pl.BlockSpec((1, c_pad), lambda i, r: (0, 0)),          # bn1 scale
            pl.BlockSpec((1, c_pad), lambda i, r: (0, 0)),          # bn1 shift
        ],
        out_specs=[
            pl.BlockSpec((1, tile_h, wo, c_pad), lambda i, r: (i, r, 0, 0)),
            pl.BlockSpec((1, 1, c_pad), lambda i, r: (i * n_rb + r, 0, 0)),
            pl.BlockSpec((1, 1, c_pad), lambda i, r: (i * n_rb + r, 0, 0)),
        ],
        out_shape=[
            jax.ShapeDtypeStruct((n, ho, wo, c_pad), jnp.float32),   # z2
            jax.ShapeDtypeStruct((n * n_rb, 1, c_pad), jnp.float32),  # sum
            jax.ShapeDtypeStruct((n * n_rb, 1, c_pad), jnp.float32),  # sumsq
        ],
        compiler_params=_cparams(),
    )(zblk, w2, sc1, sh1)


# ----------------------------------------------------------------------------
# Kernel C: out = relu(bn2(conv2) + bn3(conv3))  (two fused affines + ReLU)
# ----------------------------------------------------------------------------
def _bn_add_relu_kernel(z2_ref, z3_ref, sc2_ref, sh2_ref, sc3_ref, sh3_ref,
                        o_ref):
    y = z2_ref[...] * sc2_ref[...] + sh2_ref[...]
    y = y + z3_ref[...] * sc3_ref[...] + sh3_ref[...]
    o_ref[...] = jnp.maximum(y, 0.0)


def bn_add_relu_call(z2, z3, sc2, sh2, sc3, sh3, *, n, n_rb, tile_h, wo, c_pad):
    ho = n_rb * tile_h
    vec = pl.BlockSpec((1, c_pad), lambda i, r: (0, 0))
    img = pl.BlockSpec((1, tile_h, wo, c_pad), lambda i, r: (i, r, 0, 0))
    return pl.pallas_call(
        _bn_add_relu_kernel,
        grid=(n, n_rb),
        in_specs=[img, img, vec, vec, vec, vec],
        out_specs=pl.BlockSpec((1, tile_h, wo, c_pad),
                               lambda i, r: (i, r, 0, 0)),
        out_shape=jax.ShapeDtypeStruct((n, ho, wo, c_pad), jnp.float32),
        compiler_params=_cparams(),
    )(z2, z3, sc2, sh2, sc3, sh3)


# ----------------------------------------------------------------------------
# Host-side glue (layout prep, tiny per-channel math)
# ----------------------------------------------------------------------------
def _prep_w13(w1, w3, c_pad):
    """[Cout,Cin,k,k] x2 -> bf16 [round_up(k*k*Cin,128), 2*c_pad], rows (kh,kw,cin)."""
    def prep(w):
        cout, cin, kh, kw = w.shape
        m = jnp.transpose(w, (2, 3, 1, 0)).reshape(kh * kw * cin, cout)
        return jnp.pad(m, ((0, 0), (0, c_pad - cout)))
    k = jnp.concatenate([prep(w1), prep(w3)], axis=1)
    k_pad = _round_up(k.shape[0], LANE)
    k = jnp.pad(k, ((0, k_pad - k.shape[0]), (0, 0)))
    return k.astype(jnp.bfloat16)


def _prep_w2(w2, c_pad):
    """[Cout,Cin,k,k] -> bf16 [k,k,c_pad,c_pad] (tap-indexed, channel-padded)."""
    cout, cin, kh, kw = w2.shape
    w = jnp.transpose(w2, (2, 3, 1, 0))
    w = jnp.pad(w, ((0, 0), (0, 0), (0, c_pad - cin), (0, c_pad - cout)))
    return w.astype(jnp.bfloat16)


def _pad_vec(v, c_pad):
    v = jnp.asarray(v, jnp.float32).reshape(1, -1)
    return jnp.pad(v, ((0, 0), (0, c_pad - v.shape[1])))


def _extract_patches(x_nhwc, ksize, stride, pad, k_pad):
    """x [N,H,W,Cin] -> bf16 patches [N*Ho*Wo, k_pad], columns ordered (kh,kw,cin)."""
    n, h, w, c = x_nhwc.shape
    xp = jnp.pad(x_nhwc, ((0, 0), (pad, pad), (pad, pad), (0, 0)))
    ho = (h + 2 * pad - ksize) // stride + 1
    wo = (w + 2 * pad - ksize) // stride + 1
    cols = [xp[:, kh:kh + stride * ho:stride, kw:kw + stride * wo:stride, :]
            for kh in range(ksize) for kw in range(ksize)]
    p = jnp.stack(cols, axis=3).reshape(n * ho * wo, ksize * ksize * c)
    p = jnp.pad(p, ((0, 0), (0, k_pad - p.shape[1])))
    return p.astype(jnp.bfloat16), ho, wo


def _stats_to_affine(s, sq, count, gamma, beta):
    """(sum, sum_sq) [1,C] -> (scale, shift) so y = z*scale + shift == BN(z)."""
    mean = s / count
    var = jnp.maximum(sq / count - mean * mean, 0.0)
    rstd = lax.rsqrt(var + EPS)
    scale = gamma * rstd
    shift = beta - mean * scale
    return scale, shift


# ----------------------------------------------------------------------------
# Res_2d forward (stride=2, cin != cout  =>  diff=True path, like the spec)
# ----------------------------------------------------------------------------
def res_2d_forward(x_nchw, params, shape=3, stride=2, tile_h=None):
    assert shape % 2 == 1
    pad = shape // 2
    n, cin, h, w = x_nchw.shape
    cout = params["w1"].shape[0]
    c_pad = _round_up(cout, LANE)

    # Boundary NCHW -> NHWC (channels on lanes); bf16 MXU operands.
    x_nhwc = jnp.transpose(x_nchw, (0, 2, 3, 1)).astype(jnp.bfloat16)
    k1_pad = _round_up(shape * shape * cin, LANE)
    patches, ho, wo = _extract_patches(x_nhwc, shape, stride, pad, k1_pad)

    # Row-block tiling: tile_h rows of the output image per grid step.
    # On v7x (64 MiB VMEM) pick a smaller tile_h for large C; larger on v5e/v6e.
    if tile_h is None:
        target = max(1, 1024 // max(wo, 1))
        tile_h = 1
        for cand in range(min(ho, target), 0, -1):
            if ho % cand == 0:
                tile_h = cand
                break
    assert ho % tile_h == 0, "tile_h must divide Ho"
    n_rb = ho // tile_h
    tile_m = tile_h * wo
    assert tile_m % 16 == 0, "rows per tile must be a multiple of 16 (bf16 tiling)"
    m1 = n * ho * wo   # BN statistic count (all tile rows are valid)

    # ---- pass 1: conv_1 + conv_3 fused matmul + per-tile partial BN stats ---
    # (conv biases dropped: they cancel exactly through training-mode BN)
    w13 = _prep_w13(params["w1"], params["w3"], c_pad)
    z1, z3, ps13, psq13 = conv13_call(patches, w13, n=n, n_rb=n_rb,
                                      tile_h=tile_h, wo=wo, c_pad=c_pad)
    s13 = jnp.sum(ps13, axis=(0, 1)).reshape(1, -1)
    sq13 = jnp.sum(psq13, axis=(0, 1)).reshape(1, -1)
    sc1, sh1 = _stats_to_affine(s13[:, :c_pad], sq13[:, :c_pad], m1,
                                _pad_vec(params["g1"], c_pad),
                                _pad_vec(params["be1"], c_pad))
    sc3, sh3 = _stats_to_affine(s13[:, c_pad:], sq13[:, c_pad:], m1,
                                _pad_vec(params["g3"], c_pad),
                                _pad_vec(params["be3"], c_pad))

    # ---- pass 2: conv_2 via in-kernel tap loop (bn_1+ReLU fused inside) -----
    # Host-side: lay the conv_1 output out as non-overlapping halo row blocks.
    z1p = jnp.pad(z1, ((0, 0), (pad, pad), (pad, pad), (0, 0)))
    zblk = jnp.stack([z1p[:, rb * tile_h: rb * tile_h + tile_h + 2 * pad]
                      for rb in range(n_rb)], axis=1)
    zblk = zblk.reshape(n * n_rb, tile_h + 2 * pad, wo + 2 * pad, c_pad)
    w2 = _prep_w2(params["w2"], c_pad)
    z2, ps2, psq2 = conv2_call(zblk, w2, sc1, sh1, n=n, n_rb=n_rb,
                               tile_h=tile_h, wo=wo, c_pad=c_pad,
                               ksize=shape, pad=pad)
    s2 = jnp.sum(ps2, axis=(0, 1)).reshape(1, -1)
    sq2 = jnp.sum(psq2, axis=(0, 1)).reshape(1, -1)
    sc2, sh2 = _stats_to_affine(s2, sq2, m1,
                                _pad_vec(params["g2"], c_pad),
                                _pad_vec(params["be2"], c_pad))

    # ---- pass 3: out = relu(bn2(conv2) + bn3(conv3)) -------------------------
    out = bn_add_relu_call(z2, z3, sc2, sh2, sc3, sh3, n=n, n_rb=n_rb,
                           tile_h=tile_h, wo=wo, c_pad=c_pad)

    out = out[:, :, :, :cout]
    return jnp.transpose(out, (0, 3, 1, 2))   # back to NCHW


# ----------------------------------------------------------------------------
# Pure-JAX reference (bf16-operand convs + biases, f32 training-mode BN)
# ----------------------------------------------------------------------------
def _conv_bf16(x, w, b, stride, pad):
    y = jax.lax.conv_general_dilated(
        x.astype(jnp.bfloat16), w.astype(jnp.bfloat16),
        (stride, stride), [(pad, pad), (pad, pad)],
        dimension_numbers=("NCHW", "OIHW", "NCHW"),
        preferred_element_type=jnp.float32)
    return y + b.reshape(1, -1, 1, 1)


def _bn_train(y, gamma, beta):
    mean = y.mean(axis=(0, 2, 3), keepdims=True)
    var = ((y - mean) ** 2).mean(axis=(0, 2, 3), keepdims=True)
    return ((y - mean) * jax.lax.rsqrt(var + EPS)
            * gamma.reshape(1, -1, 1, 1) + beta.reshape(1, -1, 1, 1))


def res_2d_reference(x, params, shape=3, stride=2):
    pad = shape // 2
    y1 = jax.nn.relu(
        _bn_train(_conv_bf16(x, params["w1"], params["b1"].ravel(), stride, pad),
                  params["g1"].ravel(), params["be1"].ravel()))
    out = _bn_train(_conv_bf16(y1, params["w2"], params["b2"].ravel(), 1, pad),
                    params["g2"].ravel(), params["be2"].ravel())
    sc = _bn_train(_conv_bf16(x, params["w3"], params["b3"].ravel(), stride, pad),
                   params["g3"].ravel(), params["be3"].ravel())
    return jax.nn.relu(sc + out)


# ----------------------------------------------------------------------------
def make_params(key, cin, cout, shape=3):
    ks = jax.random.split(key, 6)

    def w(k, o, i):
        return 0.1 * jax.random.normal(k, (o, i, shape, shape), jnp.float32)

    def b(k, o):
        return 0.1 * jax.random.normal(k, (1, o), jnp.float32)

    return {
        "w1": w(ks[0], cout, cin),  "b1": b(ks[1], cout),
        "w2": w(ks[2], cout, cout), "b2": b(ks[3], cout),
        "w3": w(ks[4], cout, cin),  "b3": b(ks[5], cout),
        "g1": jnp.ones((1, cout), jnp.float32), "be1": jnp.zeros((1, cout), jnp.float32),
        "g2": jnp.ones((1, cout), jnp.float32), "be2": jnp.zeros((1, cout), jnp.float32),
        "g3": jnp.ones((1, cout), jnp.float32), "be3": jnp.zeros((1, cout), jnp.float32),
    }


if __name__ == "__main__":
    key = jax.random.PRNGKey(0)
    k_x, k_p = jax.random.split(key)

    N, CIN, COUT, H, W = 2, 4, 8, 16, 16
    x = jax.random.normal(k_x, (N, CIN, H, W), jnp.float32)
    params = make_params(k_p, CIN, COUT)

    # tile_h=4 -> two row-blocks per image: exercises the multi-tile grid,
    # the halo handling of interior vs. border blocks and the per-tile
    # partial-statistics reduction path.
    fwd = jax.jit(functools.partial(res_2d_forward, tile_h=4))
    out = jax.block_until_ready(fwd(x, params))
    ref = jax.block_until_ready(jax.jit(res_2d_reference)(x, params))

    assert out.shape == (N, COUT, H // 2, W // 2), out.shape
    np.testing.assert_allclose(np.asarray(out), np.asarray(ref),
                               rtol=5e-3, atol=5e-3)
    print("KERNEL_OK")
</pallas_src>

<mosaic_0001>
module attributes {stable_mosaic.version = 11 : i64} {
  func.func @_conv13_kernel(%arg0: i32, %arg1: i32, %arg2: memref<32x128xbf16, #tpu.memory_space<vmem>>, %arg3: memref<128x256xbf16, #tpu.memory_space<vmem>>, %arg4: memref<1x4x8x128xf32, #tpu.memory_space<vmem>>, %arg5: memref<1x4x8x128xf32, #tpu.memory_space<vmem>>, %arg6: memref<1x1x256xf32, #tpu.memory_space<vmem>>, %arg7: memref<1x1x256xf32, #tpu.memory_space<vmem>>) attributes {dimension_semantics = [#tpu.dimension_semantics<parallel>, #tpu.dimension_semantics<parallel>], iteration_bounds = array<i64: 2, 2>, scalar_prefetch = 0 : i64, scratch_operands = 0 : i64, tpu.core_type = #tpu.core_type<tc>, window_params = [{transform_indices = @transform_0, window_bounds = array<i64: 32, 128>}, {pipeline_mode = #tpu.pipeline_mode<synchronous>, transform_indices = @transform_1, window_bounds = array<i64: 128, 256>}, {transform_indices = @transform_2, window_bounds = array<i64: 1, 4, 8, 128>}, {transform_indices = @transform_3, window_bounds = array<i64: 1, 4, 8, 128>}, {transform_indices = @transform_4, window_bounds = array<i64: 1, 1, 256>}, {transform_indices = @transform_5, window_bounds = array<i64: 1, 1, 256>}]} {
    %c0 = arith.constant 0 : index
    %c0_0 = arith.constant 0 : index
    %0 = vector.load %arg2[%c0, %c0_0] : memref<32x128xbf16, #tpu.memory_space<vmem>>, vector<32x128xbf16>
    %c0_1 = arith.constant 0 : index
    %c0_2 = arith.constant 0 : index
    %1 = vector.load %arg3[%c0_1, %c0_2] : memref<128x256xbf16, #tpu.memory_space<vmem>>, vector<128x256xbf16>
    %cst = arith.constant dense<0.000000e+00> : vector<32x256xf32>
    %2 = tpu.matmul %0, %1, %cst {dimension_numbers = #tpu.dot_dimension_numbers<[1], [0], [0], [1], [0, 0, 1, 1], [], []>} : vector<32x128xbf16>, vector<128x256xbf16>, vector<32x256xf32> -> vector<32x256xf32>
    %cst_3 = arith.constant dense<0.000000e+00> : vector<256xf32>
    %3 = vector.multi_reduction <add>, %2, %cst_3 [0] : vector<32x256xf32> to vector<256xf32>
    %4 = vector.shape_cast %3 : vector<256xf32> to vector<1x256xf32>
    %5 = vector.shape_cast %4 : vector<1x256xf32> to vector<1x1x256xf32>
    %c0_4 = arith.constant 0 : index
    %c0_5 = arith.constant 0 : index
    %c0_6 = arith.constant 0 : index
    %6 = vector.load %arg6[%c0_4, %c0_5, %c0_6] : memref<1x1x256xf32, #tpu.memory_space<vmem>>, vector<1x1x256xf32>
    tpu.vector_store %arg6[%c0_4, %c0_5, %c0_6], %5 {strides = array<i32>} : memref<1x1x256xf32, #tpu.memory_space<vmem>>, vector<1x1x256xf32>,
    %7 = arith.mulf %2, %2 : vector<32x256xf32>
    %cst_7 = arith.constant dense<0.000000e+00> : vector<256xf32>
    %8 = vector.multi_reduction <add>, %7, %cst_7 [0] : vector<32x256xf32> to vector<256xf32>
    %9 = vector.shape_cast %8 : vector<256xf32> to vector<1x256xf32>
    %10 = vector.shape_cast %9 : vector<1x256xf32> to vector<1x1x256xf32>
    %c0_8 = arith.constant 0 : index
    %c0_9 = arith.constant 0 : index
    %c0_10 = arith.constant 0 : index
    %11 = vector.load %arg7[%c0_8, %c0_9, %c0_10] : memref<1x1x256xf32, #tpu.memory_space<vmem>>, vector<1x1x256xf32>
    tpu.vector_store %arg7[%c0_8, %c0_9, %c0_10], %10 {strides = array<i32>} : memref<1x1x256xf32, #tpu.memory_space<vmem>>, vector<1x1x256xf32>,
    %12 = vector.extract_strided_slice %2 {offsets = [0, 0], sizes = [32, 128], strides = [1, 1]} : vector<32x256xf32> to vector<32x128xf32>
    %13 = vector.shape_cast %12 : vector<32x128xf32> to vector<1x4x8x128xf32>
    %c0_11 = arith.constant 0 : index
    %c0_12 = arith.constant 0 : index
    %c0_13 = arith.constant 0 : index
    %c0_14 = arith.constant 0 : index
    %14 = vector.load %arg4[%c0_11, %c0_12, %c0_13, %c0_14] : memref<1x4x8x128xf32, #tpu.memory_space<vmem>>, vector<1x4x8x128xf32>
    tpu.vector_store %arg4[%c0_11, %c0_12, %c0_13, %c0_14], %13 {strides = array<i32>} : memref<1x4x8x128xf32, #tpu.memory_space<vmem>>, vector<1x4x8x128xf32>,
    %15 = vector.extract_strided_slice %2 {offsets = [0, 128], sizes = [32, 128], strides = [1, 1]} : vector<32x256xf32> to vector<32x128xf32>
    %16 = vector.shape_cast %15 : vector<32x128xf32> to vector<1x4x8x128xf32>
    %c0_15 = arith.constant 0 : index
    %c0_16 = arith.constant 0 : index
    %c0_17 = arith.constant 0 : index
    %c0_18 = arith.constant 0 : index
    %17 = vector.load %arg5[%c0_15, %c0_16, %c0_17, %c0_18] : memref<1x4x8x128xf32, #tpu.memory_space<vmem>>, vector<1x4x8x128xf32>
    tpu.vector_store %arg5[%c0_15, %c0_16, %c0_17, %c0_18], %16 {strides = array<i32>} : memref<1x4x8x128xf32, #tpu.memory_space<vmem>>, vector<1x4x8x128xf32>,
    return
  }
  func.func @transform_0(%arg0: i32, %arg1: i32) -> (i32, i32) {
    %c2_i32 = arith.constant 2 : i32
    %0 = arith.muli %arg0, %c2_i32 : i32
    %1 = arith.addi %0, %arg1 : i32
    %c0_i32 = arith.constant 0 : i32
    %c0_i32_0 = arith.constant 0 : i32
    return %1, %c0_i32 : i32, i32
  }
  func.func @transform_1(%arg0: i32, %arg1: i32) -> (i32, i32) {
    %c0_i32 = arith.constant 0 : i32
    %c0_i32_0 = arith.constant 0 : i32
    %c0_i32_1 = arith.constant 0 : i32
    return %c0_i32, %c0_i32_0 : i32, i32
  }
  func.func @transform_2(%arg0: i32, %arg1: i32) -> (i32, i32, i32, i32) {
    %c0_i32 = arith.constant 0 : i32
    %c0_i32_0 = arith.constant 0 : i32
    %c0_i32_1 = arith.constant 0 : i32
    return %arg0, %arg1, %c0_i32, %c0_i32_0 : i32, i32, i32, i32
  }
  func.func @transform_3(%arg0: i32, %arg1: i32) -> (i32, i32, i32, i32) {
    %c0_i32 = arith.constant 0 : i32
    %c0_i32_0 = arith.constant 0 : i32
    %c0_i32_1 = arith.constant 0 : i32
    return %arg0, %arg1, %c0_i32, %c0_i32_0 : i32, i32, i32, i32
  }
  func.func @transform_4(%arg0: i32, %arg1: i32) -> (i32, i32, i32) {
    %c2_i32 = arith.constant 2 : i32
    %0 = arith.muli %arg0, %c2_i32 : i32
    %1 = arith.addi %0, %arg1 : i32
    %c0_i32 = arith.constant 0 : i32
    %c0_i32_0 = arith.constant 0 : i32
    %c0_i32_1 = arith.constant 0 : i32
    return %1, %c0_i32, %c0_i32_0 : i32, i32, i32
  }
  func.func @transform_5(%arg0: i32, %arg1: i32) -> (i32, i32, i32) {
    %c2_i32 = arith.constant 2 : i32
    %0 = arith.muli %arg0, %c2_i32 : i32
    %1 = arith.addi %0, %arg1 : i32
    %c0_i32 = arith.constant 0 : i32
    %c0_i32_0 = arith.constant 0 : i32
    %c0_i32_1 = arith.constant 0 : i32
    return %1, %c0_i32, %c0_i32_0 : i32, i32, i32
  }
}

module attributes {stable_mosaic.version = 11 : i64} {
  func.func @_conv2_kernel(%arg0: i32, %arg1: i32, %arg2: memref<1x6x10x128xf32, #tpu.memory_space<vmem>>, %arg3: memref<3x3x128x128xbf16, #tpu.memory_space<vmem>>, %arg4: memref<1x128xf32, #tpu.memory_space<vmem>>, %arg5: memref<1x128xf32, #tpu.memory_space<vmem>>, %arg6: memref<1x4x8x128xf32, #tpu.memory_space<vmem>>, %arg7: memref<1x1x128xf32, #tpu.memory_space<vmem>>, %arg8: memref<1x1x128xf32, #tpu.memory_space<vmem>>) attributes {dimension_semantics = [#tpu.dimension_semantics<parallel>, #tpu.dimension_semantics<parallel>], iteration_bounds = array<i64: 2, 2>, scalar_prefetch = 0 : i64, scratch_operands = 0 : i64, tpu.core_type = #tpu.core_type<tc>, window_params = [{transform_indices = @transform_0, window_bounds = array<i64: 1, 6, 10, 128>}, {pipeline_mode = #tpu.pipeline_mode<synchronous>, transform_indices = @transform_1, window_bounds = array<i64: 3, 3, 128, 128>}, {pipeline_mode = #tpu.pipeline_mode<synchronous>, transform_indices = @transform_2, window_bounds = array<i64: 1, 128>}, {pipeline_mode = #tpu.pipeline_mode<synchronous>, transform_indices = @transform_3, window_bounds = array<i64: 1, 128>}, {transform_indices = @transform_4, window_bounds = array<i64: 1, 4, 8, 128>}, {transform_indices = @transform_5, window_bounds = array<i64: 1, 1, 128>}, {transform_indices = @transform_6, window_bounds = array<i64: 1, 1, 128>}]} {
    %c0 = arith.constant 0 : index
    %c0_0 = arith.constant 0 : index
    %c0_1 = arith.constant 0 : index
    %c0_2 = arith.constant 0 : index
    %0 = vector.load %arg2[%c0, %c0_0, %c0_1, %c0_2] : memref<1x6x10x128xf32, #tpu.memory_space<vmem>>, vector<1x6x10x128xf32>
    %1 = vector.shape_cast %0 : vector<1x6x10x128xf32> to vector<6x10x128xf32>
    %c0_3 = arith.constant 0 : index
    %c0_4 = arith.constant 0 : index
    %2 = vector.load %arg4[%c0_3, %c0_4] : memref<1x128xf32, #tpu.memory_space<vmem>>, vector<1x128xf32>
    %3 = vector.shape_cast %2 : vector<1x128xf32> to vector<1x1x128xf32>
    %4 = vector.broadcast %3 : vector<1x1x128xf32> to vector<6x10x128xf32>
    %5 = arith.mulf %1, %4 : vector<6x10x128xf32>
    %c0_5 = arith.constant 0 : index
    %c0_6 = arith.constant 0 : index
    %6 = vector.load %arg5[%c0_5, %c0_6] : memref<1x128xf32, #tpu.memory_space<vmem>>, vector<1x128xf32>
    %7 = vector.shape_cast %6 : vector<1x128xf32> to vector<1x1x128xf32>
    %8 = vector.broadcast %7 : vector<1x1x128xf32> to vector<6x10x128xf32>
    %9 = arith.addf %5, %8 : vector<6x10x128xf32>
    %cst = arith.constant 0.000000e+00 : f32
    %10 = vector.broadcast %cst : f32 to vector<6x10x128xf32>
    %11 = arith.maximumf %9, %10 : vector<6x10x128xf32>
    %12 = tpu.iota {dimensions = array<i32: 0>} : vector<6x10x1xi32>
    %13 = tpu.iota {dimensions = array<i32: 1>} : vector<6x10x1xi32>
    %c1_i32 = arith.constant 1 : i32
    %14 = vector.broadcast %c1_i32 : i32 to vector<6x10x1xi32>
    %15 = arith.cmpi sge, %13, %14 : vector<6x10x1xi32>
    %c9_i32 = arith.constant 9 : i32
    %16 = vector.broadcast %c9_i32 : i32 to vector<6x10x1xi32>
    %17 = arith.cmpi slt, %13, %16 : vector<6x10x1xi32>
    %18 = arith.andi %15, %17 : vector<6x10x1xi1>
    %c0_i32 = arith.constant 0 : i32
    %19 = arith.cmpi sgt, %arg1, %c0_i32 : i32
    %c1_i32_7 = arith.constant 1 : i32
    %20 = vector.broadcast %c1_i32_7 : i32 to vector<6x10x1xi32>
    %21 = arith.cmpi sge, %12, %20 : vector<6x10x1xi32>
    %22 = vector.broadcast %19 : i1 to vector<6x10x1xi1>
    %23 = arith.ori %22, %21 : vector<6x10x1xi1>
    %24 = arith.andi %18, %23 : vector<6x10x1xi1>
    %c1_i32_8 = arith.constant 1 : i32
    %25 = arith.cmpi slt, %arg1, %c1_i32_8 : i32
    %c5_i32 = arith.constant 5 : i32
    %26 = vector.broadcast %c5_i32 : i32 to vector<6x10x1xi32>
    %27 = arith.cmpi slt, %12, %26 : vector<6x10x1xi32>
    %28 = vector.broadcast %25 : i1 to vector<6x10x1xi1>
    %29 = arith.ori %28, %27 : vector<6x10x1xi1>
    %30 = arith.andi %24, %29 : vector<6x10x1xi1>
    %cst_9 = arith.constant 0.000000e+00 : f32
    %31 = vector.shape_cast %30 : vector<6x10x1xi1> to vector<6x10x1xi1>
    %32 = vector.broadcast %31 : vector<6x10x1xi1> to vector<6x10x128xi1>
    %33 = vector.broadcast %cst_9 : f32 to vector<6x10x128xf32>
    %34 = arith.select %32, %11, %33 : vector<6x10x128xi1>, vector<6x10x128xf32>
    %c0_10 = arith.constant 0 : index
    %c0_11 = arith.constant 0 : index
    %c0_12 = arith.constant 0 : index
    %c0_13 = arith.constant 0 : index
    %35 = vector.load %arg3[%c0_10, %c0_11, %c0_12, %c0_13] : memref<3x3x128x128xbf16, #tpu.memory_space<vmem>>, vector<3x3x128x128xbf16>
    %cst_14 = arith.constant 0.000000e+00 : f32
    %36 = vector.broadcast %cst_14 : f32 to vector<32x128xf32>
    %37 = vector.extract_strided_slice %34 {offsets = [0, 0, 0], sizes = [4, 8, 128], strides = [1, 1, 1]} : vector<6x10x128xf32> to vector<4x8x128xf32>
    %38 = vector.shape_cast %37 : vector<4x8x128xf32> to vector<32x128xf32>
    %39 = arith.truncf %38 : vector<32x128xf32> to vector<32x128xbf16>
    %40 = vector.extract_strided_slice %35 {offsets = [0, 0, 0, 0], sizes = [1, 1, 128, 128], strides = [1, 1, 1, 1]} : vector<3x3x128x128xbf16> to vector<1x1x128x128xbf16>
    %41 = vector.shape_cast %40 : vector<1x1x128x128xbf16> to vector<128x128xbf16>
    %cst_15 = arith.constant dense<0.000000e+00> : vector<32x128xf32>
    %42 = tpu.matmul %39, %41, %cst_15 {dimension_numbers = #tpu.dot_dimension_numbers<[1], [0], [0], [1], [0, 0, 1, 1], [], []>} : vector<32x128xbf16>, vector<128x128xbf16>, vector<32x128xf32> -> vector<32x128xf32>
    %43 = arith.addf %36, %42 : vector<32x128xf32>
    %44 = vector.extract_strided_slice %34 {offsets = [0, 1, 0], sizes = [4, 8, 128], strides = [1, 1, 1]} : vector<6x10x128xf32> to vector<4x8x128xf32>
    %45 = vector.shape_cast %44 : vector<4x8x128xf32> to vector<32x128xf32>
    %46 = arith.truncf %45 : vector<32x128xf32> to vector<32x128xbf16>
    %47 = vector.extract_strided_slice %35 {offsets = [0, 1, 0, 0], sizes = [1, 1, 128, 128], strides = [1, 1, 1, 1]} : vector<3x3x128x128xbf16> to vector<1x1x128x128xbf16>
    %48 = vector.shape_cast %47 : vector<1x1x128x128xbf16> to vector<128x128xbf16>
    %cst_16 = arith.constant dense<0.000000e+00> : vector<32x128xf32>
    %49 = tpu.matmul %46, %48, %cst_16 {dimension_numbers = #tpu.dot_dimension_numbers<[1], [0], [0], [1], [0, 0, 1, 1], [], []>} : vector<32x128xbf16>, vector<128x128xbf16>, vector<32x128xf32> -> vector<32x128xf32>
    %50 = arith.addf %43, %49 : vector<32x128xf32>
    %51 = vector.extract_strided_slice %34 {offsets = [0, 2, 0], sizes = [4, 8, 128], strides = [1, 1, 1]} : vector<6x10x128xf32> to vector<4x8x128xf32>
    %52 = vector.shape_cast %51 : vector<4x8x128xf32> to vector<32x128xf32>
    %53 = arith.truncf %52 : vector<32x128xf32> to vector<32x128xbf16>
    %54 = vector.extract_strided_slice %35 {offsets = [0, 2, 0, 0], sizes = [1, 1, 128, 128], strides = [1, 1, 1, 1]} : vector<3x3x128x128xbf16> to vector<1x1x128x128xbf16>
    %55 = vector.shape_cast %54 : vector<1x1x128x128xbf16> to vector<128x128xbf16>
    %cst_17 = arith.constant dense<0.000000e+00> : vector<32x128xf32>
    %56 = tpu.matmul %53, %55, %cst_17 {dimension_numbers = #tpu.dot_dimension_numbers<[1], [0], [0], [1], [0, 0, 1, 1], [], []>} : vector<32x128xbf16>, vector<128x128xbf16>, vector<32x128xf32> -> vector<32x128xf32>
    %57 = arith.addf %50, %56 : vector<32x128xf32>
    %58 = vector.extract_strided_slice %34 {offsets = [1, 0, 0], sizes = [4, 8, 128], strides = [1, 1, 1]} : vector<6x10x128xf32> to vector<4x8x128xf32>
    %59 = vector.shape_cast %58 : vector<4x8x128xf32> to vector<32x128xf32>
    %60 = arith.truncf %59 : vector<32x128xf32> to vector<32x128xbf16>
    %61 = vector.extract_strided_slice %35 {offsets = [1, 0, 0, 0], sizes = [1, 1, 128, 128], strides = [1, 1, 1, 1]} : vector<3x3x128x128xbf16> to vector<1x1x128x128xbf16>
    %62 = vector.shape_cast %61 : vector<1x1x128x128xbf16> to vector<128x128xbf16>
    %cst_18 = arith.constant dense<0.000000e+00> : vector<32x128xf32>
    %63 = tpu.matmul %60, %62, %cst_18 {dimension_numbers = #tpu.dot_dimension_numbers<[1], [0], [0], [1], [0, 0, 1, 1], [], []>} : vector<32x128xbf16>, vector<128x128xbf16>, vector<32x128xf32> -> vector<32x128xf32>
    %64 = arith.addf %57, %63 : vector<32x128xf32>
    %65 = vector.extract_strided_slice %34 {offsets = [1, 1, 0], sizes = [4, 8, 128], strides = [1, 1, 1]} : vector<6x10x128xf32> to vector<4x8x128xf32>
    %66 = vector.shape_cast %65 : vector<4x8x128xf32> to vector<32x128xf32>
    %67 = arith.truncf %66 : vector<32x128xf32> to vector<32x128xbf16>
    %68 = vector.extract_strided_slice %35 {offsets = [1, 1, 0, 0], sizes = [1, 1, 128, 128], strides = [1, 1, 1, 1]} : vector<3x3x128x128xbf16> to vector<1x1x128x128xbf16>
    %69 = vector.shape_cast %68 : vector<1x1x128x128xbf16> to vector<128x128xbf16>
    %cst_19 = arith.constant dense<0.000000e+00> : vector<32x128xf32>
    %70 = tpu.matmul %67, %69, %cst_19 {dimension_numbers = #tpu.dot_dimension_numbers<[1], [0], [0], [1], [0, 0, 1, 1], [], []>} : vector<32x128xbf16>, vector<128x128xbf16>, vector<32x128xf32> -> vector<32x128xf32>
    %71 = arith.addf %64, %70 : vector<32x128xf32>
    %72 = vector.extract_strided_slice %34 {offsets = [1, 2, 0], sizes = [4, 8, 128], strides = [1, 1, 1]} : vector<6x10x128xf32> to vector<4x8x128xf32>
    %73 = vector.shape_cast %72 : vector<4x8x128xf32> to vector<32x128xf32>
    %74 = arith.truncf %73 : vector<32x128xf32> to vector<32x128xbf16>
    %75 = vector.extract_strided_slice %35 {offsets = [1, 2, 0, 0], sizes = [1, 1, 128, 128], strides = [1, 1, 1, 1]} : vector<3x3x128x128xbf16> to vector<1x1x128x128xbf16>
    %76 = vector.shape_cast %75 : vector<1x1x128x128xbf16> to vector<128x128xbf16>
    %cst_20 = arith.constant dense<0.000000e+00> : vector<32x128xf32>
    %77 = tpu.matmul %74, %76, %cst_20 {dimension_numbers = #tpu.dot_dimension_numbers<[1], [0], [0], [1], [0, 0, 1, 1], [], []>} : vector<32x128xbf16>, vector<128x128xbf16>, vector<32x128xf32> -> vector<32x128xf32>
    %78 = arith.addf %71, %77 : vector<32x128xf32>
    %79 = vector.extract_strided_slice %34 {offsets = [2, 0, 0], sizes = [4, 8, 128], strides = [1, 1, 1]} : vector<6x10x128xf32> to vector<4x8x128xf32>
    %80 = vector.shape_cast %79 : vector<4x8x128xf32> to vector<32x128xf32>
    %81 = arith.truncf %80 : vector<32x128xf32> to vector<32x128xbf16>
    %82 = vector.extract_strided_slice %35 {offsets = [2, 0, 0, 0], sizes = [1, 1, 128, 128], strides = [1, 1, 1, 1]} : vector<3x3x128x128xbf16> to vector<1x1x128x128xbf16>
    %83 = vector.shape_cast %82 : vector<1x1x128x128xbf16> to vector<128x128xbf16>
    %cst_21 = arith.constant dense<0.000000e+00> : vector<32x128xf32>
    %84 = tpu.matmul %81, %83, %cst_21 {dimension_numbers = #tpu.dot_dimension_numbers<[1], [0], [0], [1], [0, 0, 1, 1], [], []>} : vector<32x128xbf16>, vector<128x128xbf16>, vector<32x128xf32> -> vector<32x128xf32>
    %85 = arith.addf %78, %84 : vector<32x128xf32>
    %86 = vector.extract_strided_slice %34 {offsets = [2, 1, 0], sizes = [4, 8, 128], strides = [1, 1, 1]} : vector<6x10x128xf32> to vector<4x8x128xf32>
    %87 = vector.shape_cast %86 : vector<4x8x128xf32> to vector<32x128xf32>
    %88 = arith.truncf %87 : vector<32x128xf32> to vector<32x128xbf16>
    %89 = vector.extract_strided_slice %35 {offsets = [2, 1, 0, 0], sizes = [1, 1, 128, 128], strides = [1, 1, 1, 1]} : vector<3x3x128x128xbf16> to vector<1x1x128x128xbf16>
    %90 = vector.shape_cast %89 : vector<1x1x128x128xbf16> to vector<128x128xbf16>
    %cst_22 = arith.constant dense<0.000000e+00> : vector<32x128xf32>
    %91 = tpu.matmul %88, %90, %cst_22 {dimension_numbers = #tpu.dot_dimension_numbers<[1], [0], [0], [1], [0, 0, 1, 1], [], []>} : vector<32x128xbf16>, vector<128x128xbf16>, vector<32x128xf32> -> vector<32x128xf32>
    %92 = arith.addf %85, %91 : vector<32x128xf32>
    %93 = vector.extract_strided_slice %34 {offsets = [2, 2, 0], sizes = [4, 8, 128], strides = [1, 1, 1]} : vector<6x10x128xf32> to vector<4x8x128xf32>
    %94 = vector.shape_cast %93 : vector<4x8x128xf32> to vector<32x128xf32>
    %95 = arith.truncf %94 : vector<32x128xf32> to vector<32x128xbf16>
    %96 = vector.extract_strided_slice %35 {offsets = [2, 2, 0, 0], sizes = [1, 1, 128, 128], strides = [1, 1, 1, 1]} : vector<3x3x128x128xbf16> to vector<1x1x128x128xbf16>
    %97 = vector.shape_cast %96 : vector<1x1x128x128xbf16> to vector<128x128xbf16>
    %cst_23 = arith.constant dense<0.000000e+00> : vector<32x128xf32>
    %98 = tpu.matmul %95, %97, %cst_23 {dimension_numbers = #tpu.dot_dimension_numbers<[1], [0], [0], [1], [0, 0, 1, 1], [], []>} : vector<32x128xbf16>, vector<128x128xbf16>, vector<32x128xf32> -> vector<32x128xf32>
    %99 = arith.addf %92, %98 : vector<32x128xf32>
    %cst_24 = arith.constant dense<0.000000e+00> : vector<128xf32>
    %100 = vector.multi_reduction <add>, %99, %cst_24 [0] : vector<32x128xf32> to vector<128xf32>
    %101 = vector.shape_cast %100 : vector<128xf32> to vector<1x128xf32>
    %102 = vector.shape_cast %101 : vector<1x128xf32> to vector<1x1x128xf32>
    %c0_25 = arith.constant 0 : index
    %c0_26 = arith.constant 0 : index
    %c0_27 = arith.constant 0 : index
    %103 = vector.load %arg7[%c0_25, %c0_26, %c0_27] : memref<1x1x128xf32, #tpu.memory_space<vmem>>, vector<1x1x128xf32>
    tpu.vector_store %arg7[%c0_25, %c0_26, %c0_27], %102 {strides = array<i32>} : memref<1x1x128xf32, #tpu.memory_space<vmem>>, vector<1x1x128xf32>,
    %104 = arith.mulf %99, %99 : vector<32x128xf32>
    %cst_28 = arith.constant dense<0.000000e+00> : vector<128xf32>
    %105 = vector.multi_reduction <add>, %104, %cst_28 [0] : vector<32x128xf32> to vector<128xf32>
    %106 = vector.shape_cast %105 : vector<128xf32> to vector<1x128xf32>
    %107 = vector.shape_cast %106 : vector<1x128xf32> to vector<1x1x128xf32>
    %c0_29 = arith.constant 0 : index
    %c0_30 = arith.constant 0 : index
    %c0_31 = arith.constant 0 : index
    %108 = vector.load %arg8[%c0_29, %c0_30, %c0_31] : memref<1x1x128xf32, #tpu.memory_space<vmem>>, vector<1x1x128xf32>
    tpu.vector_store %arg8[%c0_29, %c0_30, %c0_31], %107 {strides = array<i32>} : memref<1x1x128xf32, #tpu.memory_space<vmem>>, vector<1x1x128xf32>,
    %109 = vector.shape_cast %99 : vector<32x128xf32> to vector<1x4x8x128xf32>
    %c0_32 = arith.constant 0 : index
    %c0_33 = arith.constant 0 : index
    %c0_34 = arith.constant 0 : index
    %c0_35 = arith.constant 0 : index
    %110 = vector.load %arg6[%c0_32, %c0_33, %c0_34, %c0_35] : memref<1x4x8x128xf32, #tpu.memory_space<vmem>>, vector<1x4x8x128xf32>
    tpu.vector_store %arg6[%c0_32, %c0_33, %c0_34, %c0_35], %109 {strides = array<i32>} : memref<1x4x8x128xf32, #tpu.memory_space<vmem>>, vector<1x4x8x128xf32>,
    return
  }
  func.func @transform_0(%arg0: i32, %arg1: i32) -> (i32, i32, i32, i32) {
    %c2_i32 = arith.constant 2 : i32
    %0 = arith.muli %arg0, %c2_i32 : i32
    %1 = arith.addi %0, %arg1 : i32
    %c0_i32 = arith.constant 0 : i32
    %c0_i32_0 = arith.constant 0 : i32
    %c0_i32_1 = arith.constant 0 : i32
    %c0_i32_2 = arith.constant 0 : i32
    return %1, %c0_i32, %c0_i32_0, %c0_i32_1 : i32, i32, i32, i32
  }
  func.func @transform_1(%arg0: i32, %arg1: i32) -> (i32, i32, i32, i32) {
    %c0_i32 = arith.constant 0 : i32
    %c0_i32_0 = arith.constant 0 : i32
    %c0_i32_1 = arith.constant 0 : i32
    %c0_i32_2 = arith.constant 0 : i32
    %c0_i32_3 = arith.constant 0 : i32
    return %c0_i32, %c0_i32_0, %c0_i32_1, %c0_i32_2 : i32, i32, i32, i32
  }
  func.func @transform_2(%arg0: i32, %arg1: i32) -> (i32, i32) {
    %c0_i32 = arith.constant 0 : i32
    %c0_i32_0 = arith.constant 0 : i32
    %c0_i32_1 = arith.constant 0 : i32
    return %c0_i32, %c0_i32_0 : i32, i32
  }
  func.func @transform_3(%arg0: i32, %arg1: i32) -> (i32, i32) {
    %c0_i32 = arith.constant 0 : i32
    %c0_i32_0 = arith.constant 0 : i32
    %c0_i32_1 = arith.constant 0 : i32
    return %c0_i32, %c0_i32_0 : i32, i32
  }
  func.func @transform_4(%arg0: i32, %arg1: i32) -> (i32, i32, i32, i32) {
    %c0_i32 = arith.constant 0 : i32
    %c0_i32_0 = arith.constant 0 : i32
    %c0_i32_1 = arith.constant 0 : i32
    return %arg0, %arg1, %c0_i32, %c0_i32_0 : i32, i32, i32, i32
  }
  func.func @transform_5(%arg0: i32, %arg1: i32) -> (i32, i32, i32) {
    %c2_i32 = arith.constant 2 : i32
    %0 = arith.muli %arg0, %c2_i32 : i32
    %1 = arith.addi %0, %arg1 : i32
    %c0_i32 = arith.constant 0 : i32
    %c0_i32_0 = arith.constant 0 : i32
    %c0_i32_1 = arith.constant 0 : i32
    return %1, %c0_i32, %c0_i32_0 : i32, i32, i32
  }
  func.func @transform_6(%arg0: i32, %arg1: i32) -> (i32, i32, i32) {
    %c2_i32 = arith.constant 2 : i32
    %0 = arith.muli %arg0, %c2_i32 : i32
    %1 = arith.addi %0, %arg1 : i32
    %c0_i32 = arith.constant 0 : i32
    %c0_i32_0 = arith.constant 0 : i32
    %c0_i32_1 = arith.constant 0 : i32
    return %1, %c0_i32, %c0_i32_0 : i32, i32, i32
  }
}

module attributes {stable_mosaic.version = 11 : i64} {
  func.func @_bn_add_relu_kernel(%arg0: i32, %arg1: i32, %arg2: memref<1x4x8x128xf32, #tpu.memory_space<vmem>>, %arg3: memref<1x4x8x128xf32, #tpu.memory_space<vmem>>, %arg4: memref<1x128xf32, #tpu.memory_space<vmem>>, %arg5: memref<1x128xf32, #tpu.memory_space<vmem>>, %arg6: memref<1x128xf32, #tpu.memory_space<vmem>>, %arg7: memref<1x128xf32, #tpu.memory_space<vmem>>, %arg8: memref<1x4x8x128xf32, #tpu.memory_space<vmem>>) attributes {dimension_semantics = [#tpu.dimension_semantics<parallel>, #tpu.dimension_semantics<parallel>], iteration_bounds = array<i64: 2, 2>, scalar_prefetch = 0 : i64, scratch_operands = 0 : i64, tpu.core_type = #tpu.core_type<tc>, window_params = [{transform_indices = @transform_0, window_bounds = array<i64: 1, 4, 8, 128>}, {transform_indices = @transform_1, window_bounds = array<i64: 1, 4, 8, 128>}, {pipeline_mode = #tpu.pipeline_mode<synchronous>, transform_indices = @transform_2, window_bounds = array<i64: 1, 128>}, {pipeline_mode = #tpu.pipeline_mode<synchronous>, transform_indices = @transform_3, window_bounds = array<i64: 1, 128>}, {pipeline_mode = #tpu.pipeline_mode<synchronous>, transform_indices = @transform_4, window_bounds = array<i64: 1, 128>}, {pipeline_mode = #tpu.pipeline_mode<synchronous>, transform_indices = @transform_5, window_bounds = array<i64: 1, 128>}, {transform_indices = @transform_6, window_bounds = array<i64: 1, 4, 8, 128>}]} {
    %c0 = arith.constant 0 : index
    %c0_0 = arith.constant 0 : index
    %c0_1 = arith.constant 0 : index
    %c0_2 = arith.constant 0 : index
    %0 = vector.load %arg2[%c0, %c0_0, %c0_1, %c0_2] : memref<1x4x8x128xf32, #tpu.memory_space<vmem>>, vector<1x4x8x128xf32>
    %c0_3 = arith.constant 0 : index
    %c0_4 = arith.constant 0 : index
    %1 = vector.load %arg4[%c0_3, %c0_4] : memref<1x128xf32, #tpu.memory_space<vmem>>, vector<1x128xf32>
    %2 = vector.shape_cast %1 : vector<1x128xf32> to vector<1x1x1x128xf32>
    %3 = vector.broadcast %2 : vector<1x1x1x128xf32> to vector<1x4x8x128xf32>
    %4 = arith.mulf %0, %3 : vector<1x4x8x128xf32>
    %c0_5 = arith.constant 0 : index
    %c0_6 = arith.constant 0 : index
    %5 = vector.load %arg5[%c0_5, %c0_6] : memref<1x128xf32, #tpu.memory_space<vmem>>, vector<1x128xf32>
    %6 = vector.shape_cast %5 : vector<1x128xf32> to vector<1x1x1x128xf32>
    %7 = vector.broadcast %6 : vector<1x1x1x128xf32> to vector<1x4x8x128xf32>
    %8 = arith.addf %4, %7 : vector<1x4x8x128xf32>
    %c0_7 = arith.constant 0 : index
    %c0_8 = arith.constant 0 : index
    %c0_9 = arith.constant 0 : index
    %c0_10 = arith.constant 0 : index
    %9 = vector.load %arg3[%c0_7, %c0_8, %c0_9, %c0_10] : memref<1x4x8x128xf32, #tpu.memory_space<vmem>>, vector<1x4x8x128xf32>
    %c0_11 = arith.constant 0 : index
    %c0_12 = arith.constant 0 : index
    %10 = vector.load %arg6[%c0_11, %c0_12] : memref<1x128xf32, #tpu.memory_space<vmem>>, vector<1x128xf32>
    %11 = vector.shape_cast %10 : vector<1x128xf32> to vector<1x1x1x128xf32>
    %12 = vector.broadcast %11 : vector<1x1x1x128xf32> to vector<1x4x8x128xf32>
    %13 = arith.mulf %9, %12 : vector<1x4x8x128xf32>
    %14 = arith.addf %8, %13 : vector<1x4x8x128xf32>
    %c0_13 = arith.constant 0 : index
    %c0_14 = arith.constant 0 : index
    %15 = vector.load %arg7[%c0_13, %c0_14] : memref<1x128xf32, #tpu.memory_space<vmem>>, vector<1x128xf32>
    %16 = vector.shape_cast %15 : vector<1x128xf32> to vector<1x1x1x128xf32>
    %17 = vector.broadcast %16 : vector<1x1x1x128xf32> to vector<1x4x8x128xf32>
    %18 = arith.addf %14, %17 : vector<1x4x8x128xf32>
    %cst = arith.constant 0.000000e+00 : f32
    %19 = vector.broadcast %cst : f32 to vector<1x4x8x128xf32>
    %20 = arith.maximumf %18, %19 : vector<1x4x8x128xf32>
    %c0_15 = arith.constant 0 : index
    %c0_16 = arith.constant 0 : index
    %c0_17 = arith.constant 0 : index
    %c0_18 = arith.constant 0 : index
    %21 = vector.load %arg8[%c0_15, %c0_16, %c0_17, %c0_18] : memref<1x4x8x128xf32, #tpu.memory_space<vmem>>, vector<1x4x8x128xf32>
    tpu.vector_store %arg8[%c0_15, %c0_16, %c0_17, %c0_18], %20 {strides = array<i32>} : memref<1x4x8x128xf32, #tpu.memory_space<vmem>>, vector<1x4x8x128xf32>,
    return
  }
  func.func @transform_0(%arg0: i32, %arg1: i32) -> (i32, i32, i32, i32) {
    %c0_i32 = arith.constant 0 : i32
    %c0_i32_0 = arith.constant 0 : i32
    %c0_i32_1 = arith.constant 0 : i32
    return %arg0, %arg1, %c0_i32, %c0_i32_0 : i32, i32, i32, i32
  }
  func.func @transform_1(%arg0: i32, %arg1: i32) -> (i32, i32, i32, i32) {
    %c0_i32 = arith.constant 0 : i32
    %c0_i32_0 = arith.constant 0 : i32
    %c0_i32_1 = arith.constant 0 : i32
    return %arg0, %arg1, %c0_i32, %c0_i32_0 : i32, i32, i32, i32
  }
  func.func @transform_2(%arg0: i32, %arg1: i32) -> (i32, i32) {
    %c0_i32 = arith.constant 0 : i32
    %c0_i32_0 = arith.constant 0 : i32
    %c0_i32_1 = arith.constant 0 : i32
    return %c0_i32, %c0_i32_0 : i32, i32
  }
  func.func @transform_3(%arg0: i32, %arg1: i32) -> (i32, i32) {
    %c0_i32 = arith.constant 0 : i32
    %c0_i32_0 = arith.constant 0 : i32
    %c0_i32_1 = arith.constant 0 : i32
    return %c0_i32, %c0_i32_0 : i32, i32
  }
  func.func @transform_4(%arg0: i32, %arg1: i32) -> (i32, i32) {
    %c0_i32 = arith.constant 0 : i32
    %c0_i32_0 = arith.constant 0 : i32
    %c0_i32_1 = arith.constant 0 : i32
    return %c0_i32, %c0_i32_0 : i32, i32
  }
  func.func @transform_5(%arg0: i32, %arg1: i32) -> (i32, i32) {
    %c0_i32 = arith.constant 0 : i32
    %c0_i32_0 = arith.constant 0 : i32
    %c0_i32_1 = arith.constant 0 : i32
    return %c0_i32, %c0_i32_0 : i32, i32
  }
  func.func @transform_6(%arg0: i32, %arg1: i32) -> (i32, i32, i32, i32) {
    %c0_i32 = arith.constant 0 : i32
    %c0_i32_0 = arith.constant 0 : i32
    %c0_i32_1 = arith.constant 0 : i32
    return %arg0, %arg1, %c0_i32, %c0_i32_0 : i32, i32, i32, i32
  }
}

</mosaic_0001>

<bundles_post_ra>
// kernel: res_2d_forward.3
= control target key start
LH: loop header
LB: loop body
LE: loop exit
PB: predicated region body
PF: predicated region fallthrough
CT: control target
= control target key end

     0   :  { %s996_s18 = smov 0   ;;  %s998_s19 = smov 0   ;;  %s1122_s0 = inlined_call_operand.vmem [shape: bf16[128,128], index: 0, kind: input, shape index: {}]   ;;  %s1123_s1 = inlined_call_operand.vmem [shape: bf16[128,256], index: 1, kind: input, shape index: {}]   ;;  %s1124_s2 = inlined_call_operand.vmem [shape: f32[2,8,8,128], index: 2, kind: output, shape index: {0}]   ;;  %s1125_s3 = inlined_call_operand.vmem [shape: f32[2,8,8,128], index: 3, kind: output, shape index: {1}]   ;;  %s1126_s4 = inlined_call_operand.vmem [shape: f32[4,1,256], index: 4, kind: output, shape index: {2}]   ;;  %s1127_s5 = inlined_call_operand.vmem [shape: f32[4,1,256], index: 5, kind: output, shape index: {3}]  }
   0x1   :  { %s1000_s20 = smov 0   ;;  %s1002_s21 = smov 0  }
   0x2   :  { %s1004_s22 = smov 0  }
   0x3 LB: > { %s25_s23 = sadd.s32 1, %s954_s20  ;;  %s28_s24 = sadd.s32 1, %s958_s21  ;;  %s962_s22 = sphi %s1004_s22, %s16_s22   ;;  %s958_s21 = sphi %s1002_s21, %s1131_s21   ;;  %s954_s20 = sphi %s1000_s20, %s1130_s20   ;;  %s950_s19 = sphi %s998_s19, %s1129_s19   ;;  %s946_s18 = sphi %s996_s18, %s1128_s18  }
   0x4   : > { %p26_p0 = scmp.ge.s32.totalorder %s25_s23, 2  ;;  %p806_p1 = scmp.ge.s32.totalorder %s962_s22, 1 }
   0x5   : > { %p227_p2 = scmp.lt.s32.totalorder %s962_s22, 5 }
   0x6   : > { %s1133_s23 = smov (%p26_p0, %s25_s23), 0  ;;  %s1135_s24 = smov (!%p26_p0, %s28_s24), %s958_s21 }
   0x7   : > { %p228_p3 = pnand %p806_p1, %p227_p2  ;;  %p30_p4 = scmp.ge.s32.totalorder %s1135_s24, 2 }
   0x8   : > { %s807_s27 = sshll.u32 (!%p228_p3), %s950_s19, 1  ;;  %s810_s6 = sshll.u32 (!%p228_p3), %s946_s18, 2 }
   0x9   : > { %s1137_s24 = smov (%p30_p4, %s1135_s24), 0  ;;  %231 = sbr.rel (%p228_p3) target bundleno = 274 (0x112), region = 28 }
   0xa   : > { %s1038_s30 = sadd.s32 (!%p228_p3), %s946_s18, %s807_s27  ;;  %p293_p6 = scmp.lt.s32.totalorder (!%p228_p3), %s950_s19, 1 }
   0xb   : > { %s808_s8 = sshll.u32 (!%p228_p3), %s1038_s30, 2  ;;  %p295_p7 = scmp.lt.s32.totalorder (!%p228_p3), %s810_s6, 7 }
   0xc   : > { %p285_p5 = scmp.lt.s32.totalorder (!%p228_p3), %s808_s8, 15  ;;  %p314_p8 = scmp.lt.s32.totalorder (!%p228_p3), %s1038_s30, 3 }
   0xe   : > { %v898_v0 = vld [vmem:[%s1123_s1 + $0x74] ss:$8 sps:$4 sm:$0xff]   ;;  %v900_v1 = vld [vmem:[%s1123_s1 + $0x70] ss:$8 sps:$4 sm:$0xff]   ;;  %v964_v2 = vmov 0   ;;  %s1139_s8 = smov (!%p285_p5, %s808_s8), 15  ;;  %v518_v53 = vlaneseq }
   0xf   : > { %473 = vmatprep.mubr.bf16.mxu0 %v964_v2  ;;  %483 = vmatprep.mubr.bf16.mxu1 %v964_v2  ;;  %v901_v3 = vld [vmem:[%s1123_s1 + $0x64] ss:$8 sps:$4 sm:$0xff]   ;;  %v903_v4 = vld [vmem:[%s1123_s1 + $0x60] ss:$8 sps:$4 sm:$0xff]   ;;  %v904_v5 = vld [vmem:[%s1123_s1 + $0x54] ss:$8 sps:$4 sm:$0xff]  }
  0x10   : > { %441 = vmatprep.subr.bf16.mxu0 %v898_v0  ;;  %840 = vmatprep.subr.bf16.mxu1 %v898_v0  ;;  %v906_v6 = vld [vmem:[%s1123_s1 + $0x50] ss:$8 sps:$4 sm:$0xff]   ;;  %s809_s15 = sshll.u32 %s1139_s8, 2  ;;  %v907_v7 = vld [vmem:[%s1123_s1 + $0x44] ss:$8 sps:$4 sm:$0xff]   ;;  %s1141_s19 = smov (!%p293_p6, %s950_s19), 1 }
  0x11   : > { %442 = vmatpush1.bf16.msra.mxu0 %v900_v1  ;;  %848 = vmatpush1.bf16.msra.mxu1 %v900_v1  ;;  %s1059_s27 = scalar_lea.vmem %s1122_s0, %s809_s15  ;;  %v909_v8 = vld [vmem:[%s1123_s1 + $0x40] ss:$8 sps:$4 sm:$0xff]   ;;  %v910_v9 = vld [vmem:[%s1123_s1 + $0x34] ss:$8 sps:$4 sm:$0xff]   ;;  %v912_v10 = vld [vmem:[%s1123_s1 + $0x30] ss:$8 sps:$4 sm:$0xff]  }
  0x12   : > { %443 = vmatprep.subr.bf16.mxu0 %v901_v3  ;;  %841 = vmatprep.subr.bf16.mxu1 %v901_v3  ;;  %v913_v11 = vld [vmem:[%s1123_s1 + $0x24] ss:$8 sps:$4 sm:$0xff]   ;;  %v915_v12 = vld [vmem:[%s1123_s1 + $0x20] ss:$8 sps:$4 sm:$0xff]   ;;  %v916_v13 = vld [vmem:[%s1123_s1 + $0x14] ss:$8 sps:$4 sm:$0xff]  }
  0x13   : > { %v918_v14 = vld [vmem:[%s1123_s1 + $0x10] ss:$8 sps:$4 sm:$0xff]   ;;  %v919_v15 = vld [vmem:[%s1123_s1 + $0x4] ss:$8 sps:$4 sm:$0xff]   ;;  %v921_v16 = vld [vmem:[%s1123_s1] ss:$8 sps:$4 sm:$0xff]  }
  0x14   : > { %v922_v17 = vld [vmem:[%s1059_s27] sm:$0xff]   ;;  %v923_v18 = vld [vmem:[%s1059_s27 + $0x8] sm:$0xff]   ;;  %s1143_s6 = smov (!%p295_p7, %s810_s6), 7  ;;  %s811_s7 = sshll.u32 %s1141_s19, 3  ;;  %v965_v51 = vmov 1966171168  }
  0x15   : > { %444 = vmatpush1.bf16.msra.mxu0 %v903_v4  ;;  %849 = vmatpush1.bf16.msra.mxu1 %v903_v4  ;;  %s298_s8 = sadd.s32 %s811_s7, %s1143_s6  ;;  %v516_v52 = vunpack.c.l.s4 %v965_v51  ;;  %v519_v63 = vshrl.u32 %v518_v53, 7  ;;  %s1145_s30 = smov (!%p314_p8, %s1038_s30), 3  ;;  %vm532_vm0 = vcmp.lt.s32.totalorder %v518_v53, 256 }
  0x16   : > { %445 = vmatprep.subr.bf16.mxu0 %v904_v5  ;;  %842 = vmatprep.subr.bf16.mxu1 %v904_v5  ;;  %s812_s9 = sshll.u32 %s298_s8, 3  ;;  %s817_s18 = sshll.u32 %s1145_s30, 1 }
  0x17   : > { %s300_s12 = scalar_lea.vmem %s1124_s2, %s812_s9  ;;  %s310_s14 = scalar_lea.vmem %s1125_s3, %s812_s9  ;;  %v517_v62 = vunpack.c.0.s8 %v516_v52 }
  0x18   : > { %s317_s16 = scalar_lea.vmem %s1126_s4, %s817_s18  ;;  %s325_s26 = scalar_lea.vmem %s1127_s5, %s817_s18 }
  0x19   : > { %446 = vmatpush1.bf16.msra.mxu0 %v906_v6  ;;  %850 = vmatpush1.bf16.msra.mxu1 %v906_v6 }
  0x1a   : > { %447 = vmatprep.subr.bf16.mxu0 %v907_v7  ;;  %843 = vmatprep.subr.bf16.mxu1 %v907_v7 }
  0x1d   : > { %448 = vmatpush1.bf16.msra.mxu0 %v909_v8  ;;  %851 = vmatpush1.bf16.msra.mxu1 %v909_v8 }
  0x1e   : > { %449 = vmatprep.subr.bf16.mxu0 %v910_v9  ;;  %844 = vmatprep.subr.bf16.mxu1 %v910_v9  ;;  %v520_v9 = vsub.s32 %v517_v62, %v519_v63 }
  0x21   : > { %450 = vmatpush1.bf16.msra.mxu0 %v912_v10  ;;  %852 = vmatpush1.bf16.msra.mxu1 %v912_v10 }
  0x22   : > { %451 = vmatprep.subr.bf16.mxu0 %v913_v11  ;;  %845 = vmatprep.subr.bf16.mxu1 %v913_v11 }
  0x25   : > { %452 = vmatpush1.bf16.msra.mxu0 %v915_v12  ;;  %853 = vmatpush1.bf16.msra.mxu1 %v915_v12 }
  0x26   : > { %453 = vmatprep.subr.bf16.mxu0 %v916_v13  ;;  %846 = vmatprep.subr.bf16.mxu1 %v916_v13 }
  0x29   : > { %454 = vmatpush1.bf16.msra.mxu0 %v918_v14  ;;  %854 = vmatpush1.bf16.msra.mxu1 %v918_v14 }
  0x2a   : > { %455 = vmatprep.subr.bf16.mxu0 %v919_v15  ;;  %847 = vmatprep.subr.bf16.mxu1 %v919_v15 }
  0x2d   : > { %456 = vmatpush1.bf16.msra.mxu0 %v921_v16  ;;  %855 = vmatpush1.bf16.msra.mxu1 %v921_v16 }
  0x30   : > { %474 = vmatmul.mubr.bf16.vlgmr.msra.gmra.mxu0 %v922_v17  ;;  %484 = vmatmul.mubr.bf16.vlgmr.msra.gmra.mxu1 %v923_v18 }
  0xf0   : > { %v475_v19 = vpop.f32.mrf.mxu0  ;;  %v485_v20 = vpop.f32.mrf.mxu1 }
  0xf1   : > { %580 = vst [vmem:[%s300_s12] sm:$0xff] %v475_v19  ;;  %582 = vst [vmem:[%s300_s12 + $0x10] sm:$0xff] %v485_v20  ;;  %v535_v25 = vmul.f32 %v475_v19, %v475_v19  ;;  %v539_v28 = vmul.f32 %v485_v20, %v485_v20 }
  0xf2   : > { %v477_v21 = vpop.f32.mrf.mxu0  ;;  %v487_v22 = vpop.f32.mrf.mxu1 }
  0xf3   : > { %584 = vst [vmem:[%s310_s14] sm:$0xff] %v477_v21  ;;  %586 = vst [vmem:[%s310_s14 + $0x10] sm:$0xff] %v487_v22  ;;  %v536_v29 = vmul.f32 %v477_v21, %v477_v21  ;;  %v540_v36 = vmul.f32 %v487_v22, %v487_v22 }
  0xf4   : > { %v479_v23 = vpop.f32.mrf.mxu0  ;;  %v489_v24 = vpop.f32.mrf.mxu1 }
  0xf5   : > { %v494_v26 = vadd.f32 %v479_v23, %v475_v19  ;;  %v537_v27 = vmul.f32 %v479_v23, %v479_v23  ;;  %581 = vst [vmem:[%s300_s12 + $0x8] sm:$0xff] %v479_v23  ;;  %583 = vst [vmem:[%s300_s12 + $0x18] sm:$0xff] %v489_v24  ;;  %v541_v37 = vmul.f32 %v489_v24, %v489_v24 }
  0xf6   : > { %v481_v30 = vpop.f32.mrf.mxu0  ;;  %v491_v31 = vpop.f32.mrf.mxu1 }
  0xf7   : > { %v543_v32 = vadd.f32 %v537_v27, %v535_v25  ;;  %v495_v33 = vadd.f32 %v494_v26, %v485_v20  ;;  %v503_v34 = vadd.f32 %v481_v30, %v477_v21  ;;  %v538_v35 = vmul.f32 %v481_v30, %v481_v30  ;;  %585 = vst [vmem:[%s310_s14 + $0x8] sm:$0xff] %v481_v30 }
  0xf8   : > { %587 = vst [vmem:[%s310_s14 + $0x18] sm:$0xff] %v491_v31  ;;  %v542_v42 = vmul.f32 %v491_v31, %v491_v31 }
  0xf9   : > { %v496_v38 = vadd.f32 %v495_v33, %v489_v24  ;;  %v544_v39 = vadd.f32 %v543_v32, %v539_v28  ;;  %v552_v40 = vadd.f32 %v538_v35, %v536_v29  ;;  %v504_v41 = vadd.f32 %v503_v34, %v487_v22 }
  0xfb   : > { %v497_v43 = vrot.slane %v496_v38, 4  ;;  %v545_v44 = vadd.f32 %v544_v39, %v541_v37  ;;  %v505_v45 = vadd.f32 %v504_v41, %v491_v31  ;;  %v553_v46 = vadd.f32 %v552_v40, %v540_v36 }
  0xfd   : > { %v498_v47 = vadd.f32 %v497_v43, %v496_v38  ;;  %v546_v48 = vrot.slane %v545_v44, 4  ;;  %v506_v49 = vrot.slane %v505_v45, 4  ;;  %v554_v50 = vadd.f32 %v553_v46, %v542_v42 }
  0xff   : > { %v499_v54 = vrot.slane %v498_v47, 2  ;;  %v547_v55 = vadd.f32 %v546_v48, %v545_v44  ;;  %v507_v56 = vadd.f32 %v506_v49, %v505_v45  ;;  %v555_v57 = vrot.slane %v554_v50, 4 }
 0x101   : > { %v500_v58 = vadd.f32 %v499_v54, %v498_v47  ;;  %v548_v59 = vrot.slane %v547_v55, 2  ;;  %v508_v60 = vrot.slane %v507_v56, 2  ;;  %v556_v61 = vadd.f32 %v555_v57, %v554_v50 }
 0x103   : > { %v501_v0 = vrot.slane %v500_v58, 1  ;;  %v549_v1 = vadd.f32 %v548_v59, %v547_v55  ;;  %v509_v2 = vadd.f32 %v508_v60, %v507_v56  ;;  %v557_v3 = vrot.slane %v556_v61, 2 }
 0x105   : > { %v550_v4 = vrot.slane %v549_v1, 1  ;;  %v510_v5 = vrot.slane %v509_v2, 1  ;;  %v558_v6 = vadd.f32 %v557_v3, %v556_v61  ;;  %v502_v7 = vadd.f32 %v501_v0, %v500_v58 }
 0x107   : > { %v511_v8 = vadd.f32 %v510_v5, %v509_v2  ;;  %v559_v10 = vrot.slane %v558_v6, 1  ;;  %v551_v11 = vadd.f32 %v550_v4, %v549_v1 }
 0x109   : > { %v514_v12 = vcombine.low %v502_v7, %v511_v8  ;;  %v560_v13 = vadd.f32 %v559_v10, %v558_v6 }
 0x10b   : > { %v521_v14 = vrot.slane %v514_v12, %v520_v9  ;;  %v563_v15 = vcombine.low %v551_v11, %v560_v13 }
 0x10d   : > { %v528_v16 = vrot.slane %v521_v14, %v520_v9  ;;  %v570_v17 = vrot.slane %v563_v15, %v520_v9 }
 0x10f   : > { %534 = vst.msk [vmem:[%s317_s16] sm:$0x3] %vm532_vm0, %v528_v16  ;;  %v577_v18 = vrot.slane %v570_v17, %v520_v9 }
 0x111   : > { %579 = vst.msk [vmem:[%s325_s26] sm:$0x3] %vm532_vm0, %v577_v18 }
 0x112 PF: > { %s16_s22 = sadd.s32 1, %s962_s22   ;;  %s1128_s18 = smov %s954_s20 }
 0x113   : > { %p13_p9 = scmp.ge.s32.totalorder %s16_s22, 6   ;;  %s1129_s19 = smov %s958_s21 }
 0x114   : > { %s1130_s20 = smov %s1133_s23  ;;  %s1131_s21 = smov %s1137_s24 }
 0x115   :  { %15 = sbr.rel (!%p13_p9) target bundleno = 3 (0x3), region = 94 }

// kernel: res_2d_forward.5
= control target key start
LH: loop header
LB: loop body
LE: loop exit
PB: predicated region body
PF: predicated region fallthrough
CT: control target
= control target key end

     0   :  { %s634_s21 = smov 0   ;;  %s636_s22 = smov 0   ;;  %s705_s0 = inlined_call_operand.vmem [shape: f32[2,8,8,128], index: 0, kind: input, shape index: {}]   ;;  %s706_s1 = inlined_call_operand.vmem [shape: f32[2,8,8,128], index: 1, kind: input, shape index: {}]   ;;  %s707_s2 = inlined_call_operand.vmem [shape: f32[1,128], index: 2, kind: input, shape index: {}]   ;;  %s708_s3 = inlined_call_operand.vmem [shape: f32[1,128], index: 3, kind: input, shape index: {}]   ;;  %s709_s4 = inlined_call_operand.vmem [shape: f32[1,128], index: 4, kind: input, shape index: {}]   ;;  %s710_s5 = inlined_call_operand.vmem [shape: f32[1,128], index: 5, kind: input, shape index: {}]   ;;  %s711_s6 = inlined_call_operand.vmem [shape: f32[2,8,8,128], index: 6, kind: output, shape index: {}]  }
   0x1   :  { %s638_s23 = smov 0   ;;  %s640_s24 = smov 0  }
   0x2   :  { %s642_s25 = smov 0  }
   0x3 LB: > { %s25_s26 = sadd.s32 1, %s589_s23  ;;  %s28_s27 = sadd.s32 1, %s593_s24  ;;  %s597_s25 = sphi %s642_s25, %s16_s25   ;;  %s593_s24 = sphi %s640_s24, %s715_s24   ;;  %s589_s23 = sphi %s638_s23, %s714_s23   ;;  %s585_s22 = sphi %s636_s22, %s713_s22   ;;  %s581_s21 = sphi %s634_s21, %s712_s21  }
   0x4   : > { %p26_p0 = scmp.ge.s32.totalorder %s25_s26, 2  ;;  %p503_p1 = scmp.ge.s32.totalorder %s597_s25, 1 }
   0x5   : > { %p250_p2 = scmp.lt.s32.totalorder %s597_s25, 5 }
   0x6   : > { %s717_s26 = smov (%p26_p0, %s25_s26), 0  ;;  %s719_s27 = smov (!%p26_p0, %s28_s27), %s593_s24 }
   0x7   : > { %p251_p3 = pnand %p503_p1, %p250_p2  ;;  %p30_p4 = scmp.ge.s32.totalorder %s719_s27, 2 }
   0x8   : > { %s504_s28 = sshll.u32 (!%p251_p3), %s581_s21, 2  ;;  %p298_p5 = scmp.lt.s32.totalorder (!%p251_p3), %s585_s22, 1 }
   0x9   : > { %s721_s27 = smov (%p30_p4, %s719_s27), 0  ;;  %254 = sbr.rel (%p251_p3) target bundleno = 33 (0x21), region = 44 }
   0xa   : > { %p300_p6 = scmp.lt.s32.totalorder (!%p251_p3), %s504_s28, 7 }
   0xe   : > { %s723_s22 = smov (!%p298_p5, %s585_s22), 1  ;;  %s725_s28 = smov (!%p300_p6, %s504_s28), 7  ;;  %v513_v0 = vld [vmem:[%s707_s2] ss:$0 sm:$0xff] }
   0xf   : > { %s505_s29 = sshll.u32 %s723_s22, 3  ;;  %v515_v1 = vld [vmem:[%s709_s4] ss:$0 sm:$0xff] }
  0x10   : > { %s303_s30 = sadd.s32 %s505_s29, %s725_s28  ;;  %v514_v2 = vld [vmem:[%s708_s3] ss:$0 sm:$0xff] }
  0x11   : > { %s664_s7 = sshll.u32 %s303_s30, 3  ;;  %v516_v21 = vld [vmem:[%s710_s5] ss:$0 sm:$0xff] }
  0x12   : > { %s305_s14 = scalar_lea.vmem %s705_s0, %s664_s7  ;;  %s315_s17 = scalar_lea.vmem %s706_s1, %s664_s7 }
  0x13   : > { %v327_v3 = vld [vmem:[%s305_s14] sm:$0xff]  ;;  %v328_v5 = vld [vmem:[%s305_s14 + $0x8] sm:$0xff]  ;;  %v329_v10 = vld [vmem:[%s305_s14 + $0x10] sm:$0xff]  ;;  %s325_s29 = scalar_lea.vmem %s711_s6, %s664_s7 }
  0x14   : > { %v353_v4 = vld [vmem:[%s315_s17] sm:$0xff]  ;;  %v338_v6 = vmul.f32 %v513_v0, %v327_v3  ;;  %v339_v8 = vmul.f32 %v513_v0, %v328_v5  ;;  %v354_v9 = vld [vmem:[%s315_s17 + $0x8] sm:$0xff]  ;;  %v355_v11 = vld [vmem:[%s315_s17 + $0x10] sm:$0xff]  ;;  %v340_v13 = vmul.f32 %v513_v0, %v329_v10 }
  0x15   : > { %v364_v7 = vmul.f32 %v515_v1, %v353_v4  ;;  %v365_v12 = vmul.f32 %v515_v1, %v354_v9  ;;  %v366_v14 = vmul.f32 %v515_v1, %v355_v11  ;;  %v330_v15 = vld [vmem:[%s305_s14 + $0x18] sm:$0xff] }
  0x16   : > { %v356_v16 = vld [vmem:[%s315_s17 + $0x18] sm:$0xff]  ;;  %v349_v17 = vadd.f32 %v514_v2, %v338_v6  ;;  %v350_v18 = vadd.f32 %v514_v2, %v339_v8  ;;  %v341_v19 = vmul.f32 %v513_v0, %v330_v15  ;;  %v351_v22 = vadd.f32 %v514_v2, %v340_v13 }
  0x17   : > { %v367_v20 = vmul.f32 %v515_v1, %v356_v16 }
  0x18   : > { %v368_v23 = vadd.f32 %v364_v7, %v349_v17  ;;  %v369_v24 = vadd.f32 %v365_v12, %v350_v18  ;;  %v352_v25 = vadd.f32 %v514_v2, %v341_v19  ;;  %v370_v26 = vadd.f32 %v366_v14, %v351_v22 }
  0x1a   : > { %v379_v27 = vadd.f32 %v516_v21, %v368_v23  ;;  %v380_v28 = vadd.f32 %v516_v21, %v369_v24  ;;  %v371_v29 = vadd.f32 %v367_v20, %v352_v25  ;;  %v381_v30 = vadd.f32 %v516_v21, %v370_v26 }
  0x1c   : > { %v383_v31 = vmax.f32 %v379_v27, 0.0  ;;  %v384_v32 = vmax.f32 %v380_v28, 0.0  ;;  %v382_v33 = vadd.f32 %v516_v21, %v371_v29  ;;  %v385_v34 = vmax.f32 %v381_v30, 0.0 }
  0x1e   : > { %387 = vst [vmem:[%s325_s29] sm:$0xff] %v383_v31  ;;  %388 = vst [vmem:[%s325_s29 + $0x8] sm:$0xff] %v384_v32  ;;  %v386_v35 = vmax.f32 %v382_v33, 0.0 }
  0x1f   : > { %389 = vst [vmem:[%s325_s29 + $0x10] sm:$0xff] %v385_v34 }
  0x20   : > { %390 = vst [vmem:[%s325_s29 + $0x18] sm:$0xff] %v386_v35 }
  0x21 PF: > { %s16_s25 = sadd.s32 1, %s597_s25   ;;  %s712_s21 = smov %s589_s23 }
  0x22   : > { %p13_p7 = scmp.ge.s32.totalorder %s16_s25, 6   ;;  %s713_s22 = smov %s593_s24 }
  0x23   : > { %s714_s23 = smov %s717_s26  ;;  %s715_s24 = smov %s721_s27 }
  0x24   :  { %15 = sbr.rel (!%p13_p7) target bundleno = 3 (0x3), region = 77 }

// kernel: res_2d_forward.4
= control target key start
LH: loop header
LB: loop body
LE: loop exit
PB: predicated region body
PF: predicated region fallthrough
CT: control target
= control target key end

     0   :  { %s2304_s21 = smov 0   ;;  %s2306_s22 = smov 0   ;;  %s2819_s0 = inlined_call_operand.vmem [shape: f32[4,6,10,128], index: 0, kind: input, shape index: {}]   ;;  %s2820_s1 = inlined_call_operand.vmem [shape: bf16[3,3,128,128], index: 1, kind: input, shape index: {}]   ;;  %s2821_s2 = inlined_call_operand.vmem [shape: f32[1,128], index: 2, kind: input, shape index: {}]   ;;  %s2822_s3 = inlined_call_operand.vmem [shape: f32[1,128], index: 3, kind: input, shape index: {}]   ;;  %s2823_s4 = inlined_call_operand.vmem [shape: f32[2,8,8,128], index: 4, kind: output, shape index: {0}]   ;;  %s2824_s5 = inlined_call_operand.vmem [shape: f32[4,1,128], index: 5, kind: output, shape index: {1}]   ;;  %s2825_s6 = inlined_call_operand.vmem [shape: f32[4,1,128], index: 6, kind: output, shape index: {2}]  }
   0x1   :  { %s2308_s23 = smov 0   ;;  %s2310_s24 = smov 0  }
   0x2   :  { %s2312_s25 = smov 0  }
   0x3 LB: > { %s26_s26 = sadd.s32 1, %s2259_s23  ;;  %s29_s27 = sadd.s32 1, %s2263_s24  ;;  %s2267_s25 = sphi %s2312_s25, %s17_s25   ;;  %s2263_s24 = sphi %s2310_s24, %s2837_s24   ;;  %s2259_s23 = sphi %s2308_s23, %s2836_s23   ;;  %s2255_s22 = sphi %s2306_s22, %s2835_s22   ;;  %s2251_s21 = sphi %s2304_s21, %s2834_s21  }
   0x4   : > { %p27_p0 = scmp.ge.s32.totalorder %s26_s26, 2  ;;  %p1744_p1 = scmp.ge.s32.totalorder %s2267_s25, 1 }
   0x5   : > { %p247_p2 = scmp.lt.s32.totalorder %s2267_s25, 5 }
   0x6   : > { %s2839_s26 = smov (%p27_p0, %s26_s26), 0  ;;  %s2841_s27 = smov (!%p27_p0, %s29_s27), %s2263_s24 }
   0x7   : > { %p248_p3 = pnand %p1744_p1, %p247_p2  ;;  %p31_p4 = scmp.ge.s32.totalorder %s2841_s27, 2 }
   0x8   : > { %s1745_s30 = sshll.u32 (!%p248_p3), %s2255_s22, 1  ;;  %p398_p6 = scmp.gt.s32.totalorder (!%p248_p3), %s2251_s21, 0 }
   0x9   : > { %s2843_s27 = smov (%p31_p4, %s2841_s27), 0  ;;  %251 = sbr.rel (%p248_p3) target bundleno = 397 (0x18d), region = 36 }
   0xa   : > { %s294_s9 = sadd.s32 (!%p248_p3), %s2251_s21, %s1745_s30  ;;  %p406_p7 = scmp.lt.s32.totalorder (!%p248_p3), %s2251_s21, 1 }
   0xb   : > { %p295_p5 = scmp.lt.s32.totalorder (!%p248_p3), %s294_s9, 3  ;;  %p303_p8 = scmp.lt.s32.totalorder (!%p248_p3), %s2255_s22, 1 }
   0xe   : > { %v2157_v0 = vld [vmem:[%s2820_s1 + $0x78] sm:$0xff]   ;;  %v2159_v2 = vld [vmem:[%s2820_s1 + $0x70] sm:$0xff]   ;;  %v2161_v4 = vld [vmem:[%s2820_s1 + $0x68] sm:$0xff]   ;;  %s2845_s9 = smov (!%p295_p5, %s294_s9), 3  ;;  %v389_v6 = vlaneseq  ;;  %vm592_vm5 = vcmask 1046528   ;;  %vm805_vm6 = vcmask 1045504  }
   0xf   : > { %v2158_v1 = vld [vmem:[%s2820_s1 + $0x38] sm:$0xff]   ;;  %1936 = vmatprep.subr.bf16.mxu0 %v2157_v0  ;;  %v2160_v3 = vld [vmem:[%s2820_s1 + $0x30] sm:$0xff]   ;;  %v2162_v5 = vld [vmem:[%s2820_s1 + $0x28] sm:$0xff]   ;;  %s2116_s29 = smul.u32 96, %s2845_s9  ;;  %s2847_s22 = smov (!%p303_p8, %s2255_s22), 1 }
  0x10   : > { %1956 = vmatprep.subr.bf16.mxu1 %v2158_v1  ;;  %1937 = vmatpush3.bf16.msra.mxu0 %v2157_v0  ;;  %v2163_v7 = vld [vmem:[%s2820_s1 + $0x60] sm:$0xff]   ;;  %v2367_v9 = vshrl.u32 %v389_v6, 7  ;;  %v2165_v10 = vld [vmem:[%s2820_s1 + $0x58] sm:$0xff]   ;;  %v2167_v12 = vld [vmem:[%s2820_s1 + $0x50] sm:$0xff]   ;;  %s399_s18 = scalar_select %p398_p6, 1, 0 }
  0x11   : > { %1957 = vmatpush3.bf16.msra.mxu1 %v2158_v1  ;;  %1938 = vmatprep.subr.bf16.mxu0 %v2159_v2  ;;  %v2164_v8 = vld [vmem:[%s2820_s1 + $0x20] sm:$0xff]   ;;  %v2166_v11 = vld [vmem:[%s2820_s1 + $0x18] sm:$0xff]   ;;  %s2379_s13 = scalar_lea.vmem %s2819_s0, %s2116_s29  ;;  %v2168_v14 = vld [vmem:[%s2820_s1 + $0x10] sm:$0xff]   ;;  %s316_s10 = scalar_lea.vmem %s2824_s5, %s2845_s9 }
  0x12   : > { %1958 = vmatprep.subr.bf16.mxu1 %v2160_v3  ;;  %v2385_v13 = vadd.s32 8, %v2367_v9  ;;  %v327_v15 = vld [vmem:[%s2379_s13] sm:$0xff]  ;;  %v328_v16 = vld [vmem:[%s2379_s13 + $0x8] sm:$0x3]  ;;  %v329_v17 = vld [vmem:[%s2379_s13 + $0x10] sm:$0xff]  ;;  %vm392_vm0 = vcmp.ge.s32.totalorder %v2367_v9, 1  ;;  %v400_v23 = vstv %s399_s18  ;;  %s323_s14 = scalar_lea.vmem %s2825_s6, %s2845_s9 }
  0x13   : > { %v330_v18 = vld [vmem:[%s2379_s13 + $0x18] sm:$0x3]  ;;  %v331_v19 = vld [vmem:[%s2379_s13 + $0x20] sm:$0xff]  ;;  %v332_v20 = vld [vmem:[%s2379_s13 + $0x28] sm:$0x3]  ;;  %vm401_vm2 = vcmp.eq.s32.totalorder %v400_v23, 1 }
  0x14   : > { %1939 = vmatpush3.bf16.msra.mxu0 %v2159_v2  ;;  %v2399_v21 = vld [vmem:[%s2821_s2] ss:$0 sm:$0xff]  ;;  %vm395_vm1 = vcmp.lt.s32.totalorder %v2385_v13, 9  ;;  %v2169_v24 = vld [vmem:[%s2820_s1 + $0x48] sm:$0xff]   ;;  %v333_v29 = vld [vmem:[%s2379_s13 + $0x30] sm:$0xff] }
  0x15   : > { %1959 = vmatpush3.bf16.msra.mxu1 %v2160_v3  ;;  %1940 = vmatprep.subr.bf16.mxu0 %v2161_v4  ;;  %v2404_v22 = vld [vmem:[%s2822_s3] ss:$0 sm:$0xff]  ;;  %v346_v25 = vmul.f32 %v2399_v21, %v327_v15  ;;  %v347_v26 = vmul.f32 %v2399_v21, %v328_v16  ;;  %v348_v27 = vmul.f32 %v2399_v21, %v329_v17  ;;  %v334_v30 = vld [vmem:[%s2379_s13 + $0x38] sm:$0x3]  ;;  %v2170_v31 = vld [vmem:[%s2820_s1 + $0x8] sm:$0xff]  }
  0x16   : > { %1960 = vmatprep.subr.bf16.mxu1 %v2162_v5  ;;  %v349_v28 = vmul.f32 %v2399_v21, %v330_v18  ;;  %v350_v32 = vmul.f32 %v2399_v21, %v331_v19  ;;  %v351_v33 = vmul.f32 %v2399_v21, %v332_v20  ;;  %vm2428_vm3 = vmand %vm392_vm0, %vm401_vm2  ;;  %v336_v39 = vld [vmem:[%s2379_s13 + $0x48] sm:$0x3]  ;;  %v2171_v40 = vld [vmem:[%s2820_s1 + $0x40] sm:$0xff]   ;;  %v352_v44 = vmul.f32 %v2399_v21, %v333_v29  ;;  %s407_s20 = scalar_select %p406_p7, 1, 0 }
  0x17   : > { %v365_v34 = vadd.f32 %v2404_v22, %v346_v25  ;;  %v366_v35 = vadd.f32 %v2404_v22, %v347_v26  ;;  %v367_v36 = vadd.f32 %v2404_v22, %v348_v27  ;;  %vm2440_vm4 = vmand %vm395_vm1, %vm401_vm2  ;;  %v2172_v49 = vld [vmem:[%s2820_s1] sm:$0xff]   ;;  %v353_v53 = vmul.f32 %v2399_v21, %v334_v30  ;;  %v2216_v27 = vld [vmem:[%s2820_s1 + $0x1d0] sm:$0xff]  }
  0x18   : > { %1941 = vmatpush3.bf16.msra.mxu0 %v2161_v4  ;;  %v368_v37 = vadd.f32 %v2404_v22, %v349_v28  ;;  %v369_v41 = vadd.f32 %v2404_v22, %v350_v32  ;;  %v370_v42 = vadd.f32 %v2404_v22, %v351_v33  ;;  %v335_v52 = vld [vmem:[%s2379_s13 + $0x40] sm:$0xff]  ;;  %v355_v54 = vmul.f32 %v2399_v21, %v336_v39  ;;  %v2173_v4 = vld [vmem:[%s2820_s1 + $0xb8] sm:$0xff]   ;;  %vm1770_vm7 = vmpackc.low %vm392_vm0, %vm2428_vm3 }
  0x19   : > { %1961 = vmatpush3.bf16.msra.mxu1 %v2162_v5  ;;  %1942 = vmatprep.subr.bf16.mxu0 %v2163_v7  ;;  %v377_v45 = vmax.f32 %v365_v34, 0.0  ;;  %v378_v46 = vmax.f32 %v366_v35, 0.0  ;;  %v2445_v47 = vmax.f32 %v367_v36, 0.0  ;;  %v354_v1 = vmul.f32 %v2399_v21, %v335_v52  ;;  %v2174_v5 = vld [vmem:[%s2820_s1 + $0xf8] sm:$0xff]   ;;  %vm2508_vm8 = vmpackc.low %vm392_vm0, %vm392_vm0  ;;  %v2177_v52 = vld [vmem:[%s2820_s1 + $0xa8] sm:$0xff]  }
  0x1a   : > { %1962 = vmatprep.subr.bf16.mxu1 %v2164_v8  ;;  %v380_v48 = vmax.f32 %v368_v37, 0.0  ;;  %v2450_v50 = vmax.f32 %v369_v41, 0.0  ;;  %v382_v51 = vmax.f32 %v370_v42, 0.0  ;;  %v371_v2 = vadd.f32 %v2404_v22, %v352_v44  ;;  %v2178_v44 = vld [vmem:[%s2820_s1 + $0xe8] sm:$0xff]   ;;  %v2224_v9 = vld [vmem:[%s2820_s1 + $0x220] sm:$0xff]  }
  0x1b   : > { %v426_v55 = vsel %vm2428_vm3, %v377_v45, 0.0  ;;  %v427_v56 = vsel %vm2440_vm4, %v378_v46, 0.0  ;;  %v428_v57 = vsel %vm392_vm0, %v2445_v47, 0.0  ;;  %v372_v15 = vadd.f32 %v2404_v22, %v353_v53  ;;  %v2182_v53 = vld [vmem:[%s2820_s1 + $0xd8] sm:$0xff]  }
  0x1c   : > { %1943 = vmatpush3.bf16.msra.mxu0 %v2163_v7  ;;  %v429_v58 = vsel %vm395_vm1, %v380_v48, 0.0  ;;  %v2467_v59 = vsel %vm392_vm0, %v2450_v50, 0.0  ;;  %v2471_v60 = vsel %vm395_vm1, %v382_v51, 0.0  ;;  %v593_v61 = vrot.slane %v426_v55, 1  ;;  %v2175_v48 = vld [vmem:[%s2820_s1 + $0xb0] sm:$0xff]   ;;  %v2180_v51 = vld [vmem:[%s2820_s1 + $0xe0] sm:$0xff]  }
  0x1d   : > { %1963 = vmatpush3.bf16.msra.mxu1 %v2164_v8  ;;  %1944 = vmatprep.subr.bf16.mxu0 %v2165_v10  ;;  %v594_v62 = vrot.slane %v427_v56, 1  ;;  %v596_v63 = vrot.slane %v428_v57, 1  ;;  %v597_v0 = vrot.slane %v429_v58, 1  ;;  %v599_v7 = vrot.slane %v2467_v59, 1 }
  0x1e   : > { %1964 = vmatprep.subr.bf16.mxu1 %v2166_v11  ;;  %v600_v8 = vrot.slane %v2471_v60, 1  ;;  %v373_v16 = vadd.f32 %v2404_v22, %v354_v1  ;;  %v374_v17 = vadd.f32 %v2404_v22, %v355_v54  ;;  %v2496_v18 = vmax.f32 %v371_v2, 0.0  ;;  %v2179_v54 = vld [vmem:[%s2820_s1 + $0xa0] sm:$0xff]  }
  0x1f   : > { %v595_v3 = vsel %vm592_vm5, %v593_v61, %v594_v62  ;;  %v2483_v6 = vsel %vm592_vm5, %v596_v63, %v597_v0  ;;  %v809_v19 = vrot.slane %v428_v57, 2  ;;  %v810_v20 = vrot.slane %v429_v58, 2  ;;  %v2186_v57 = vld [vmem:[%s2820_s1 + $0xc8] sm:$0xff]   ;;  %v2183_v58 = vld [vmem:[%s2820_s1 + $0x90] sm:$0xff]   ;;  %v2188_v61 = vld [vmem:[%s2820_s1 + $0xc0] sm:$0xff]  }
  0x20   : > { %1945 = vmatpush3.bf16.msra.mxu0 %v2165_v10  ;;  %v609_v10 = vpack.c.bf16 %v2483_v6, %v595_v3  ;;  %v384_v23 = vmax.f32 %v372_v15, 0.0  ;;  %v386_v25 = vmax.f32 %v374_v17, 0.0  ;;  %v2503_v26 = vsel %vm392_vm0, %v2496_v18, 0.0  ;;  %v2185_v62 = vld [vmem:[%s2820_s1 + $0x88] sm:$0xff]   ;;  %v2190_v3 = vld [vmem:[%s2820_s1 + $0x178] sm:$0xff]   ;;  %v2191_v15 = vld [vmem:[%s2820_s1 + $0x130] sm:$0xff]  }
  0x21   : > { %1965 = vmatpush3.bf16.msra.mxu1 %v2166_v11  ;;  %1946 = vmatprep.subr.bf16.mxu0 %v2167_v12  ;;  %v806_v11 = vrot.slane %v426_v55, 2  ;;  %v2513_v28 = vsel %vm592_vm5, %v599_v7, %v600_v8  ;;  %v602_v29 = vrot.slane %v2503_v26, 1  ;;  %v2518_v30 = vpack.c.bf16 %v2496_v18, %v2450_v50  ;;  %v2184_v55 = vld [vmem:[%s2820_s1 + $0xd0] sm:$0xff]   ;;  %v2196_v17 = vld [vmem:[%s2820_s1 + $0x160] sm:$0xff]  }
  0x22   : > { %1966 = vmatprep.subr.bf16.mxu1 %v2168_v14  ;;  %1952 = vmatprep.mubr.bf16.mxu0 %v609_v10  ;;  %v2526_v33 = vsel %vm395_vm1, %v384_v23, 0.0  ;;  %v435_v35 = vsel %vm395_vm1, %v386_v25, 0.0  ;;  %v1793_v36 = vpack.c.bf16 %v2450_v50, %v2445_v47  ;;  %v812_v63 = vrot.slane %v2467_v59, 2  ;;  %v2192_v8 = vld [vmem:[%s2820_s1 + $0x170] sm:$0xff]   ;;  %v2189_v10 = vld [vmem:[%s2820_s1 + $0x138] sm:$0xff]  }
  0x23   : > { %v603_v37 = vrot.slane %v2526_v33, 1  ;;  %v1031_v39 = vrot.slane %v435_v35, 1  ;;  %v813_v0 = vrot.slane %v2471_v60, 2  ;;  %v815_v1 = vrot.slane %v2503_v26, 2  ;;  %v2198_v25 = vld [vmem:[%s2820_s1 + $0x158] sm:$0xff]  }
  0x24   : > { %1947 = vmatpush3.bf16.msra.mxu0 %v2167_v12  ;;  %v807_v12 = vrot.slane %v427_v56, 2  ;;  %v2181_v56 = vld [vmem:[%s2820_s1 + $0x98] sm:$0xff]   ;;  %v816_v2 = vrot.slane %v2526_v33, 2  ;;  %v2200_v33 = vld [vmem:[%s2820_s1 + $0x150] sm:$0xff]  }
  0x25   : > { %1967 = vmatpush3.bf16.msra.mxu1 %v2168_v14  ;;  %1948 = vmatprep.subr.bf16.mxu0 %v2169_v24  ;;  %v1771_v14 = vpack.c.bf16 %v2445_v47, %v377_v45  ;;  %v2545_v42 = vsel %vm592_vm5, %v602_v29, %v603_v37  ;;  %v1138_v45 = vrot.slane %v435_v35, 2  ;;  %v814_v59 = vsel %vm805_vm6, %v812_v63, %v813_v0  ;;  %v2215_v63 = vld [vmem:[%s2820_s1 + $0x190] sm:$0xff]   ;;  %v2220_v0 = vld [vmem:[%s2820_s1 + $0x1c0] sm:$0xff]  }
  0x26   : > { %1968 = vmatprep.subr.bf16.mxu1 %v2170_v31  ;;  %v808_v32 = vsel %vm805_vm6, %v806_v11, %v807_v12  ;;  %v2555_v46 = vpack.c.bf16 %v2545_v42, %v2513_v28  ;;  %v2613_v7 = vsel %vm805_vm6, %v815_v1, %v816_v2  ;;  %v2194_v12 = vld [vmem:[%s2820_s1 + $0x168] sm:$0xff]   ;;  %v2219_v2 = vld [vmem:[%s2820_s1 + $0x180] sm:$0xff]  }
  0x27   : > { %1972 = vmatprep.mubr.msk.bf16.mxu1 %vm1770_vm7, %v1771_v14  ;;  %v2624_v11 = vpack.c.bf16 %v2613_v7, %v814_v59  ;;  %v1034_v14 = vpack.c.bf16 %v2513_v28, %v2483_v6  ;;  %v2193_v6 = vld [vmem:[%s2820_s1 + $0x128] sm:$0xff]  }
  0x28   : > { %1949 = vmatpush3.bf16.msra.mxu0 %v2169_v24  ;;  %v2498_v24 = vmax.f32 %v373_v16, 0.0  ;;  %v408_v16 = vstv %s407_s20  ;;  %v2217_v1 = vld [vmem:[%s2820_s1 + $0x188] sm:$0xff]  }
  0x29   : > { %1969 = vmatpush3.bf16.msra.mxu1 %v2170_v31  ;;  %1950 = vmatprep.subr.bf16.mxu0 %v2171_v40  ;;  %v2176_v31 = vld [vmem:[%s2820_s1 + $0xf0] sm:$0xff]   ;;  %vm409_vm9 = vcmp.eq.s32.totalorder %v408_v16, 1 }
  0x2a   : > { %1970 = vmatprep.subr.bf16.mxu1 %v2172_v49  ;;  %v434_v34 = vsel %vm392_vm0, %v2498_v24, 0.0  ;;  %v1796_v60 = vpack.c.bf16 %v2498_v24, %v2496_v18  ;;  %v337_v18 = vld [vmem:[%s2379_s13 + $0x50] sm:$0xff]  ;;  %vm2652_vm10 = vmand %vm392_vm0, %vm409_vm9 }
  0x2b   : > { %v1030_v38 = vrot.slane %v434_v34, 1  ;;  %v1137_v41 = vrot.slane %v434_v34, 2  ;;  %vm413_vm11 = vmand %vm395_vm1, %vm409_vm9 }
  0x2c   : > { %1951 = vmatpush3.bf16.msra.mxu0 %v2171_v40  ;;  %v2540_v40 = vsel %vm805_vm6, %v809_v19, %v810_v20  ;;  %v338_v19 = vld [vmem:[%s2379_s13 + $0x58] sm:$0x3]  ;;  %v356_v20 = vmul.f32 %v2399_v21, %v337_v18  ;;  %vm1825_vm12 = vmpackc.low %vm2652_vm10, %vm392_vm0  ;;  %s1747_s13 = sshll.u32 %s2251_s21, 2  ;;  %s1748_s21 = sshll.u32 %s2847_s22, 3 }
  0x2d   : > { %1971 = vmatpush3.bf16.msra.mxu1 %v2172_v49  ;;  %1976 = vmatprep.subr.bf16.mxu0 %v2173_v4  ;;  %v2548_v43 = vsel %vm592_vm5, %v1030_v38, %v1031_v39  ;;  %v822_v49 = vpack.c.bf16 %v2540_v40, %v808_v32  ;;  %v2564_v50 = vsel %vm805_vm6, %v1137_v41, %v1138_v45  ;;  %v2202_v45 = vld [vmem:[%s2820_s1 + $0x148] sm:$0xff]   ;;  %p305_p9 = scmp.lt.s32.totalorder %s1747_s13, 7 }
  0x2e   : > { %1996 = vmatprep.subr.bf16.mxu1 %v2174_v5  ;;  %v1035_v47 = vpack.c.bf16 %v2548_v43, %v2545_v42  ;;  %v357_v23 = vmul.f32 %v2399_v21, %v338_v19  ;;  %v375_v26 = vadd.f32 %v2404_v22, %v356_v20  ;;  %v2195_v21 = vld [vmem:[%s2820_s1 + $0x120] sm:$0xff]   ;;  %v2214_v42 = vld [vmem:[%s2820_s1 + $0x1d8] sm:$0xff]  }
  0x2f   : > { %1953 = vmatmul.mubr.bf16.vlgmr.msra.gmra.mxu0 %v2555_v46  ;;  %s2849_s13 = smov (!%p305_p9, %s1747_s13), 7 }
  0x30   : > { %1973 = vmatmul.mubr.msk.bf16.vlgmr.msra.gmra.mxu1 %vm2508_vm8, %v2518_v30  ;;  %1977 = vmatpush3.bf16.msra.mxu0 %v2173_v4  ;;  %v2187_v4 = vld [vmem:[%s2820_s1 + $0x80] sm:$0xff]   ;;  %v376_v28 = vadd.f32 %v2404_v22, %v357_v23  ;;  %v2197_v22 = vld [vmem:[%s2820_s1 + $0x118] sm:$0xff]   ;;  %s308_s20 = sadd.s32 %s1748_s21, %s2849_s13 }
  0x31   : > { %1997 = vmatpush3.bf16.msra.mxu1 %v2174_v5  ;;  %2012 = vmatprep.mubr.msk.bf16.mxu1 %vm2508_vm8, %v1793_v36  ;;  %v1141_v5 = vpack.c.bf16 %v814_v59, %v2540_v40  ;;  %v2225_v59 = vld [vmem:[%s2820_s1 + $0x218] sm:$0xff]   ;;  %s1749_s28 = sshll.u32 %s308_s20, 3 }
  0x32   : > { %1998 = vmatprep.subr.bf16.mxu1 %v2176_v31  ;;  %1978 = vmatprep.subr.bf16.mxu0 %v2175_v48  ;;  %v388_v32 = vmax.f32 %v376_v28, 0.0  ;;  %s310_s22 = scalar_lea.vmem %s2823_s4, %s1749_s28 }
  0x33   : > { %1992 = vmatprep.mubr.bf16.mxu0 %v822_v49  ;;  %v2204_v49 = vld [vmem:[%s2820_s1 + $0x140] sm:$0xff]  }
  0x34   : > { %1979 = vmatpush3.bf16.msra.mxu0 %v2175_v48  ;;  %v437_v34 = vsel %vm413_vm11, %v388_v32, 0.0  ;;  %v2199_v48 = vld [vmem:[%s2820_s1 + $0x110] sm:$0xff]  }
  0x35   : > { %1999 = vmatpush3.bf16.msra.mxu1 %v2176_v31  ;;  %1980 = vmatprep.subr.bf16.mxu0 %v2177_v52  ;;  %v387_v31 = vmax.f32 %v375_v26, 0.0  ;;  %v1349_v37 = vrot.slane %v437_v34, 1  ;;  %v1455_v39 = vrot.slane %v437_v34, 2 }
  0x36   : > { %2000 = vmatprep.subr.bf16.mxu1 %v2178_v44 }
  0x37   : > { %v436_v13 = vsel %vm2652_vm10, %v387_v31, 0.0  ;;  %v2670_v35 = vpack.c.bf16 %v387_v31, %v2498_v24 }
  0x38   : > { %1981 = vmatpush3.bf16.msra.mxu0 %v2177_v52  ;;  %v1348_v36 = vrot.slane %v436_v13, 1  ;;  %v1454_v38 = vrot.slane %v436_v13, 2  ;;  %v2206_v52 = vld [vmem:[%s2820_s1 + $0x1f8] sm:$0xff]  }
  0x39   : > { %2001 = vmatpush3.bf16.msra.mxu1 %v2178_v44  ;;  %1982 = vmatprep.subr.bf16.mxu0 %v2179_v54 }
  0x3a   : > { %2002 = vmatprep.subr.bf16.mxu1 %v2180_v51  ;;  %v2673_v40 = vsel %vm592_vm5, %v1348_v36, %v1349_v37  ;;  %v2676_v41 = vsel %vm805_vm6, %v1454_v38, %v1455_v39 }
  0x3b   : > { %v1352_v44 = vpack.c.bf16 %v2673_v40, %v2548_v43  ;;  %v1458_v24 = vpack.c.bf16 %v2676_v41, %v2564_v50  ;;  %v2223_v43 = vld [vmem:[%s2820_s1 + $0x228] sm:$0xff]  }
  0x3c   : > { %1983 = vmatpush3.bf16.msra.mxu0 %v2179_v54  ;;  %v1142_v54 = vpack.c.bf16 %v2564_v50, %v2613_v7  ;;  %v2228_v7 = vld [vmem:[%s2820_s1 + $0x200] sm:$0xff]  }
  0x3d   : > { %2003 = vmatpush3.bf16.msra.mxu1 %v2180_v51  ;;  %1984 = vmatprep.subr.bf16.mxu0 %v2181_v56  ;;  %v2201_v51 = vld [vmem:[%s2820_s1 + $0x108] sm:$0xff]  }
  0x3e   : > { %2004 = vmatprep.subr.bf16.mxu1 %v2182_v53 }
  0x40   : > { %1985 = vmatpush3.bf16.msra.mxu0 %v2181_v56  ;;  %v2205_v56 = vld [vmem:[%s2820_s1 + $0x1b8] sm:$0xff]  }
  0x41   : > { %2005 = vmatpush3.bf16.msra.mxu1 %v2182_v53  ;;  %1986 = vmatprep.subr.bf16.mxu0 %v2183_v58  ;;  %v2203_v53 = vld [vmem:[%s2820_s1 + $0x100] sm:$0xff]  }
  0x42   : > { %2006 = vmatprep.subr.bf16.mxu1 %v2184_v55 }
  0x44   : > { %1987 = vmatpush3.bf16.msra.mxu0 %v2183_v58  ;;  %v2207_v58 = vld [vmem:[%s2820_s1 + $0x1b0] sm:$0xff]  }
  0x45   : > { %2007 = vmatpush3.bf16.msra.mxu1 %v2184_v55  ;;  %1988 = vmatprep.subr.bf16.mxu0 %v2185_v62  ;;  %v2208_v55 = vld [vmem:[%s2820_s1 + $0x1f0] sm:$0xff]  }
  0x46   : > { %2008 = vmatprep.subr.bf16.mxu1 %v2186_v57 }
  0x48   : > { %1989 = vmatpush3.bf16.msra.mxu0 %v2185_v62  ;;  %v2218_v62 = vld [vmem:[%s2820_s1 + $0x1c8] sm:$0xff]  }
  0x49   : > { %2009 = vmatpush3.bf16.msra.mxu1 %v2186_v57  ;;  %1990 = vmatprep.subr.bf16.mxu0 %v2187_v4  ;;  %v2210_v57 = vld [vmem:[%s2820_s1 + $0x1e8] sm:$0xff]  }
  0x4a   : > { %2010 = vmatprep.subr.bf16.mxu1 %v2188_v61 }
  0x4c   : > { %1991 = vmatpush3.bf16.msra.mxu0 %v2187_v4  ;;  %v2222_v4 = vld [vmem:[%s2820_s1 + $0x230] sm:$0xff]  }
  0x4d   : > { %2011 = vmatpush3.bf16.msra.mxu1 %v2188_v61  ;;  %2016 = vmatprep.subr.bf16.mxu0 %v2189_v10  ;;  %v2209_v61 = vld [vmem:[%s2820_s1 + $0x1a8] sm:$0xff]  }
  0x4e   : > { %2036 = vmatprep.subr.bf16.mxu1 %v2190_v3 }
  0x4f   : > { %1993 = vmatmul.mubr.bf16.vlgmr.msra.gmra.mxu0 %v2624_v11 }
  0x50   : > { %2013 = vmatmul.mubr.msk.bf16.vlgmr.msra.gmra.mxu1 %vm2508_vm8, %v1796_v60  ;;  %2017 = vmatpush3.bf16.msra.mxu0 %v2189_v10  ;;  %v2226_v60 = vld [vmem:[%s2820_s1 + $0x210] sm:$0xff]  }
  0x51   : > { %2037 = vmatpush3.bf16.msra.mxu1 %v2190_v3  ;;  %2052 = vmatprep.mubr.bf16.mxu1 %v1141_v5  ;;  %v2221_v3 = vld [vmem:[%s2820_s1 + $0x238] sm:$0xff]   ;;  %v2227_v5 = vld [vmem:[%s2820_s1 + $0x208] sm:$0xff]  }
  0x52   : > { %2038 = vmatprep.subr.bf16.mxu1 %v2192_v8  ;;  %2018 = vmatprep.subr.bf16.mxu0 %v2191_v15 }
  0x53   : > { %2032 = vmatprep.mubr.bf16.mxu0 %v1034_v14 }
  0x54   : > { %2019 = vmatpush3.bf16.msra.mxu0 %v2191_v15 }
  0x55   : > { %2039 = vmatpush3.bf16.msra.mxu1 %v2192_v8  ;;  %2020 = vmatprep.subr.bf16.mxu0 %v2193_v6 }
  0x56   : > { %2040 = vmatprep.subr.bf16.mxu1 %v2194_v12 }
  0x58   : > { %2021 = vmatpush3.bf16.msra.mxu0 %v2193_v6 }
  0x59   : > { %2041 = vmatpush3.bf16.msra.mxu1 %v2194_v12  ;;  %2022 = vmatprep.subr.bf16.mxu0 %v2195_v21 }
  0x5a   : > { %2042 = vmatprep.subr.bf16.mxu1 %v2196_v17 }
  0x5c   : > { %2023 = vmatpush3.bf16.msra.mxu0 %v2195_v21 }
  0x5d   : > { %2043 = vmatpush3.bf16.msra.mxu1 %v2196_v17  ;;  %2024 = vmatprep.subr.bf16.mxu0 %v2197_v22 }
  0x5e   : > { %2044 = vmatprep.subr.bf16.mxu1 %v2198_v25 }
  0x60   : > { %2025 = vmatpush3.bf16.msra.mxu0 %v2197_v22 }
  0x61   : > { %2045 = vmatpush3.bf16.msra.mxu1 %v2198_v25  ;;  %2026 = vmatprep.subr.bf16.mxu0 %v2199_v48 }
  0x62   : > { %2046 = vmatprep.subr.bf16.mxu1 %v2200_v33 }
  0x64   : > { %2027 = vmatpush3.bf16.msra.mxu0 %v2199_v48 }
  0x65   : > { %2047 = vmatpush3.bf16.msra.mxu1 %v2200_v33  ;;  %2028 = vmatprep.subr.bf16.mxu0 %v2201_v51 }
  0x66   : > { %2048 = vmatprep.subr.bf16.mxu1 %v2202_v45 }
  0x68   : > { %2029 = vmatpush3.bf16.msra.mxu0 %v2201_v51 }
  0x69   : > { %2049 = vmatpush3.bf16.msra.mxu1 %v2202_v45  ;;  %2030 = vmatprep.subr.bf16.mxu0 %v2203_v53 }
  0x6a   : > { %2050 = vmatprep.subr.bf16.mxu1 %v2204_v49 }
  0x6c   : > { %2031 = vmatpush3.bf16.msra.mxu0 %v2203_v53 }
  0x6d   : > { %2051 = vmatpush3.bf16.msra.mxu1 %v2204_v49  ;;  %2056 = vmatprep.subr.bf16.mxu0 %v2205_v56 }
  0x6e   : > { %2076 = vmatprep.subr.bf16.mxu1 %v2206_v52 }
  0x6f   : > { %2033 = vmatmul.mubr.bf16.vlgmr.msra.gmra.mxu0 %v1035_v47  ;;  %v2211_v47 = vld [vmem:[%s2820_s1 + $0x1a0] sm:$0xff]  }
  0x70   : > { %2053 = vmatmul.mubr.bf16.vlgmr.msra.gmra.mxu1 %v1142_v54  ;;  %2057 = vmatpush3.bf16.msra.mxu0 %v2205_v56 }
  0x71   : > { %2077 = vmatpush3.bf16.msra.mxu1 %v2206_v52  ;;  %2092 = vmatprep.mubr.bf16.mxu1 %v2555_v46  ;;  %v2212_v46 = vld [vmem:[%s2820_s1 + $0x1e0] sm:$0xff]  }
  0x72   : > { %2078 = vmatprep.subr.bf16.mxu1 %v2208_v55  ;;  %2058 = vmatprep.subr.bf16.mxu0 %v2207_v58 }
  0x73   : > { %2072 = vmatprep.mubr.msk.bf16.mxu0 %vm2508_vm8, %v2518_v30  ;;  %v2213_v30 = vld [vmem:[%s2820_s1 + $0x198] sm:$0xff]  }
  0x74   : > { %2059 = vmatpush3.bf16.msra.mxu0 %v2207_v58 }
  0x75   : > { %2079 = vmatpush3.bf16.msra.mxu1 %v2208_v55  ;;  %2060 = vmatprep.subr.bf16.mxu0 %v2209_v61 }
  0x76   : > { %2080 = vmatprep.subr.bf16.mxu1 %v2210_v57 }
  0x78   : > { %2061 = vmatpush3.bf16.msra.mxu0 %v2209_v61 }
  0x79   : > { %2081 = vmatpush3.bf16.msra.mxu1 %v2210_v57  ;;  %2062 = vmatprep.subr.bf16.mxu0 %v2211_v47 }
  0x7a   : > { %2082 = vmatprep.subr.bf16.mxu1 %v2212_v46 }
  0x7c   : > { %2063 = vmatpush3.bf16.msra.mxu0 %v2211_v47 }
  0x7d   : > { %2083 = vmatpush3.bf16.msra.mxu1 %v2212_v46  ;;  %2064 = vmatprep.subr.bf16.mxu0 %v2213_v30 }
  0x7e   : > { %2084 = vmatprep.subr.bf16.mxu1 %v2214_v42 }
  0x80   : > { %2065 = vmatpush3.bf16.msra.mxu0 %v2213_v30 }
  0x81   : > { %2085 = vmatpush3.bf16.msra.mxu1 %v2214_v42  ;;  %2066 = vmatprep.subr.bf16.mxu0 %v2215_v63 }
  0x82   : > { %2086 = vmatprep.subr.bf16.mxu1 %v2216_v27 }
  0x84   : > { %2067 = vmatpush3.bf16.msra.mxu0 %v2215_v63 }
  0x85   : > { %2087 = vmatpush3.bf16.msra.mxu1 %v2216_v27  ;;  %2068 = vmatprep.subr.bf16.mxu0 %v2217_v1 }
  0x86   : > { %2088 = vmatprep.subr.bf16.mxu1 %v2218_v62 }
  0x88   : > { %2069 = vmatpush3.bf16.msra.mxu0 %v2217_v1 }
  0x89   : > { %2089 = vmatpush3.bf16.msra.mxu1 %v2218_v62  ;;  %2070 = vmatprep.subr.bf16.mxu0 %v2219_v2 }
  0x8a   : > { %2090 = vmatprep.subr.bf16.mxu1 %v2220_v0 }
  0x8c   : > { %2071 = vmatpush3.bf16.msra.mxu0 %v2219_v2 }
  0x8d   : > { %2091 = vmatpush3.bf16.msra.mxu1 %v2220_v0  ;;  %2096 = vmatprep.subr.bf16.mxu0 %v2221_v3 }
  0x8f   : > { %2073 = vmatmul.mubr.msk.bf16.vlgmr.msra.gmra.mxu0 %vm1825_vm12, %v2670_v35 }
  0x90   : > { %2093 = vmatmul.mubr.bf16.vlgmr.msra.gmra.mxu1 %v1352_v44  ;;  %2097 = vmatpush3.bf16.msra.mxu0 %v2221_v3 }
  0x91   : > { %2112 = vmatprep.mubr.bf16.mxu0 %v2624_v11  ;;  %2098 = vmatprep.subr.bf16.mxu0 %v2222_v4 }
  0x94   : > { %2099 = vmatpush3.bf16.msra.mxu0 %v2222_v4 }
  0x95   : > { %2100 = vmatprep.subr.bf16.mxu0 %v2223_v43 }
  0x98   : > { %2101 = vmatpush3.bf16.msra.mxu0 %v2223_v43 }
  0x99   : > { %2102 = vmatprep.subr.bf16.mxu0 %v2224_v9 }
  0x9c   : > { %2103 = vmatpush3.bf16.msra.mxu0 %v2224_v9 }
  0x9d   : > { %2104 = vmatprep.subr.bf16.mxu0 %v2225_v59 }
  0xa0   : > { %2105 = vmatpush3.bf16.msra.mxu0 %v2225_v59 }
  0xa1   : > { %2106 = vmatprep.subr.bf16.mxu0 %v2226_v60 }
  0xa4   : > { %2107 = vmatpush3.bf16.msra.mxu0 %v2226_v60 }
  0xa5   : > { %2108 = vmatprep.subr.bf16.mxu0 %v2227_v5 }
  0xa8   : > { %2109 = vmatpush3.bf16.msra.mxu0 %v2227_v5 }
  0xa9   : > { %2110 = vmatprep.subr.bf16.mxu0 %v2228_v7 }
  0xac   : > { %2111 = vmatpush3.bf16.msra.mxu0 %v2228_v7 }
  0xaf   : > { %2113 = vmatmul.mubr.bf16.vlgmr.msra.gmra.mxu0 %v1458_v24 }
  0xef   : > { %v1954_v8 = vpop.f32.mrf.mxu0 }
  0xf0   : > { %v1974_v10 = vpop.f32.mrf.mxu1 }
  0xf1   : > { %v693_v11 = vpop.f32.mrf.mxu0  ;;  %v799_v22 = vadd.f32 %v1974_v10, %v1954_v8 }
  0xf2   : > { %v790_v12 = vpop.f32.mrf.mxu1 }
  0xf3   : > { %v1955_v14 = vpop.f32.mrf.mxu0  ;;  %v791_v33 = vadd.f32 %v790_v12, %v693_v11 }
  0xf4   : > { %v1975_v15 = vpop.f32.mrf.mxu1 }
  0xf5   : > { %v696_v16 = vpop.f32.mrf.mxu0  ;;  %v802_v36 = vadd.f32 %v1975_v15, %v1955_v14 }
  0xf6   : > { %v793_v18 = vpop.f32.mrf.mxu1 }
  0xf7   : > { %v794_v39 = vadd.f32 %v793_v18, %v696_v16 }
 0x10f   : > { %v1994_v17 = vpop.f32.mrf.mxu0 }
 0x110   : > { %v2014_v6 = vpop.f32.mrf.mxu1  ;;  %v923_v13 = vadd.f32 %v1994_v17, %v799_v22 }
 0x111   : > { %v906_v19 = vpop.f32.mrf.mxu0 }
 0x112   : > { %v1009_v23 = vpop.f32.mrf.mxu1  ;;  %v921_v37 = vadd.f32 %v906_v19, %v791_v33  ;;  %v1026_v40 = vadd.f32 %v2014_v6, %v923_v13 }
 0x113   : > { %v1995_v20 = vpop.f32.mrf.mxu0 }
 0x114   : > { %v2015_v26 = vpop.f32.mrf.mxu1  ;;  %v924_v41 = vadd.f32 %v1995_v20, %v802_v36  ;;  %v1024_v24 = vadd.f32 %v1009_v23, %v921_v37 }
 0x115   : > { %v909_v25 = vpop.f32.mrf.mxu0 }
 0x116   : > { %v1012_v50 = vpop.f32.mrf.mxu1  ;;  %v922_v45 = vadd.f32 %v909_v25, %v794_v39  ;;  %v1027_v52 = vadd.f32 %v2015_v26, %v924_v41 }
 0x118   : > { %v1025_v54 = vadd.f32 %v1012_v50, %v922_v45 }
 0x12f   : > { %v2034_v28 = vpop.f32.mrf.mxu0 }
 0x130   : > { %v2054_v21 = vpop.f32.mrf.mxu1  ;;  %v1135_v48 = vadd.f32 %v2034_v28, %v1026_v40 }
 0x131   : > { %v1118_v29 = vpop.f32.mrf.mxu0 }
 0x132   : > { %v1225_v32 = vpop.f32.mrf.mxu1  ;;  %v1133_v53 = vadd.f32 %v1118_v29, %v1024_v24  ;;  %v1242_v55 = vadd.f32 %v2054_v21, %v1135_v48 }
 0x133   : > { %v2035_v31 = vpop.f32.mrf.mxu0 }
 0x134   : > { %v2055_v35 = vpop.f32.mrf.mxu1  ;;  %v1136_v56 = vadd.f32 %v2035_v31, %v1027_v52  ;;  %v1240_v46 = vadd.f32 %v1225_v32, %v1133_v53 }
 0x135   : > { %v1121_v34 = vpop.f32.mrf.mxu0 }
 0x136   : > { %v1228_v44 = vpop.f32.mrf.mxu1  ;;  %v1134_v61 = vadd.f32 %v1121_v34, %v1025_v54  ;;  %v1243_v47 = vadd.f32 %v2055_v35, %v1136_v56 }
 0x138   : > { %v1241_v63 = vadd.f32 %v1228_v44, %v1134_v61 }
 0x14f   : > { %v2074_v38 = vpop.f32.mrf.mxu0 }
 0x150   : > { %v2094_v51 = vpop.f32.mrf.mxu1  ;;  %v1344_v42 = vadd.f32 %v2074_v38, %v1242_v55 }
 0x151   : > { %v1327_v49 = vpop.f32.mrf.mxu0 }
 0x152   : > { %v1435_v58 = vpop.f32.mrf.mxu1  ;;  %v1342_v27 = vadd.f32 %v1327_v49, %v1240_v46  ;;  %v1452_v0 = vadd.f32 %v2094_v51, %v1344_v42 }
 0x153   : > { %v2075_v57 = vpop.f32.mrf.mxu0 }
 0x154   : > { %v2095_v62 = vpop.f32.mrf.mxu1  ;;  %v1345_v1 = vadd.f32 %v2075_v57, %v1243_v47  ;;  %v1450_v3 = vadd.f32 %v1435_v58, %v1342_v27 }
 0x155   : > { %v1330_v30 = vpop.f32.mrf.mxu0 }
 0x156   : > { %v1343_v4 = vadd.f32 %v1330_v30, %v1241_v63  ;;  %v1438_v9 = vpop.f32.mrf.mxu1  ;;  %v1453_v60 = vadd.f32 %v2095_v62, %v1345_v1 }
 0x158   : > { %v1451_v8 = vadd.f32 %v1438_v9, %v1343_v4 }
 0x16f   : > { %v2114_v2 = vpop.f32.mrf.mxu0 }
 0x170   : > { %v1558_v43 = vadd.f32 %v2114_v2, %v1452_v0 }
 0x171   : > { %v1541_v59 = vpop.f32.mrf.mxu0 }
 0x172   : > { %1586 = vst [vmem:[%s310_s22 + $0x10] sm:$0xff] %v1558_v43  ;;  %v1556_v5 = vadd.f32 %v1541_v59, %v1450_v3  ;;  %v1572_v17 = vmul.f32 %v1558_v43, %v1558_v43 }
 0x173   : > { %v2115_v7 = vpop.f32.mrf.mxu0 }
 0x174   : > { %1584 = vst [vmem:[%s310_s22] sm:$0xff] %v1556_v5  ;;  %v1559_v10 = vadd.f32 %v2115_v7, %v1453_v60  ;;  %v1570_v14 = vmul.f32 %v1556_v5, %v1556_v5 }
 0x175   : > { %v1544_v11 = vpop.f32.mrf.mxu0 }
 0x176   : > { %1587 = vst [vmem:[%s310_s22 + $0x18] sm:$0xff] %v1559_v10  ;;  %v1557_v12 = vadd.f32 %v1544_v11, %v1451_v8  ;;  %v1573_v6 = vmul.f32 %v1559_v10, %v1559_v10 }
 0x178   : > { %v1560_v15 = vadd.f32 %v1557_v12, %v1556_v5  ;;  %v1571_v16 = vmul.f32 %v1557_v12, %v1557_v12  ;;  %1585 = vst [vmem:[%s310_s22 + $0x8] sm:$0xff] %v1557_v12 }
 0x17a   : > { %v1561_v18 = vadd.f32 %v1560_v15, %v1558_v43  ;;  %v1574_v19 = vadd.f32 %v1571_v16, %v1570_v14 }
 0x17c   : > { %v1562_v20 = vadd.f32 %v1561_v18, %v1559_v10  ;;  %v1575_v23 = vadd.f32 %v1574_v19, %v1572_v17 }
 0x17e   : > { %v1563_v25 = vrot.slane %v1562_v20, 4  ;;  %v1576_v26 = vadd.f32 %v1575_v23, %v1573_v6 }
 0x180   : > { %v1564_v28 = vadd.f32 %v1563_v25, %v1562_v20  ;;  %v1577_v50 = vrot.slane %v1576_v26, 4 }
 0x182   : > { %v1565_v29 = vrot.slane %v1564_v28, 2  ;;  %v1578_v21 = vadd.f32 %v1577_v50, %v1576_v26 }
 0x184   : > { %v1566_v31 = vadd.f32 %v1565_v29, %v1564_v28  ;;  %v1579_v32 = vrot.slane %v1578_v21, 2 }
 0x186   : > { %v1567_v22 = vrot.slane %v1566_v31, 1  ;;  %v1580_v33 = vadd.f32 %v1579_v32, %v1578_v21 }
 0x188   : > { %v1568_v13 = vadd.f32 %v1567_v22, %v1566_v31  ;;  %v1581_v34 = vrot.slane %v1580_v33, 1 }
 0x18a   : > { %1569 = vst [vmem:[%s316_s10] sm:$0x1] %v1568_v13  ;;  %v1582_v35 = vadd.f32 %v1581_v34, %v1580_v33 }
 0x18c   : > { %1583 = vst [vmem:[%s323_s14] sm:$0x1] %v1582_v35 }
 0x18d PF: > { %s17_s25 = sadd.s32 1, %s2267_s25   ;;  %s2834_s21 = smov %s2259_s23 }
 0x18e   : > { %p14_p10 = scmp.ge.s32.totalorder %s17_s25, 6   ;;  %s2835_s22 = smov %s2263_s24 }
 0x18f   : > { %s2836_s23 = smov %s2839_s26  ;;  %s2837_s24 = smov %s2843_s27 }
 0x190   :  { %16 = sbr.rel (!%p14_p10) target bundleno = 3 (0x3), region = 90 }

</bundles_post_ra>
